<compile_context>
chip_gen: v5e
topology: v5e:2x2
jax: 0.10.0
libtpu: 0.0.40
codegen_flags: <defaults>
</compile_context>

<pallas_src>
import functools

import jax
import jax.numpy as jnp
from jax.experimental import pallas as pl
from jax.experimental.pallas import tpu as pltpu

VMEM = pltpu.MemorySpace.VMEM
F32 = jnp.float32


# ----------------------------------------------------------------------------
# pallas_call helper: whole arrays live in VMEM, no grid (shapes are tiny).
# ----------------------------------------------------------------------------
def _call(kernel, out_shape, *args):
    if isinstance(out_shape, (tuple, list)):
        out_specs = tuple(pl.BlockSpec(memory_space=VMEM) for _ in out_shape)
        out_shape = tuple(out_shape)
    else:
        out_specs = pl.BlockSpec(memory_space=VMEM)
    in_specs = [pl.BlockSpec(memory_space=VMEM) for _ in args]
    return pl.pallas_call(
        kernel, out_shape=out_shape, in_specs=in_specs, out_specs=out_specs
    )(*args)


# Small matmul helpers (transposes absorbed into dot_general contracting dims).
def _mm(a, b):
    return jnp.dot(a, b, preferred_element_type=F32)


def _mm_t(a, b):  # a @ b.T without materializing the transpose
    return jax.lax.dot_general(a, b, (((1,), (1,)), ((), ())),
                               preferred_element_type=F32)


def _tm(a, b):    # a.T @ b without materializing the transpose
    return jax.lax.dot_general(a, b, (((0,), (0,)), ((), ())),
                               preferred_element_type=F32)


# ----------------------------------------------------------------------------
# Fused kernels
# ----------------------------------------------------------------------------
def _unet_head_kernel(lr_ref, sw_ref, sb_ref, dw_ref, db_ref,
                      a_ref, xs_ref, xd_ref):
    # normalize_adj_torch: A = D^{-1/2} lr^T D^{-1/2}  (row-sum based)
    lr = lr_ref[...]
    rowsum = jnp.sum(lr, axis=1, keepdims=True)
    r = jax.lax.rsqrt(rowsum)
    r = jnp.where(jnp.isinf(r), 0.0, r)
    a = lr.T * r * r.T
    a_ref[...] = a
    # start GCN with X = I:  (A @ I) @ W + b  ==  A @ W + b
    xs = _mm(a, sw_ref[...]) + sb_ref[...]
    xs_ref[...] = xs
    # first down GCN: (A @ xs) @ W + b
    xd_ref[...] = _mm(_mm(a, xs), dw_ref[...]) + db_ref[...]


def _unet_down_kernel(a_ref, xd_ref, sel_ref, val_ref, dw_ref, db_ref,
                      a_out_ref, x_out_ref):
    # GraphPool gather expressed as one-hot matmuls:
    #   new_A = sel @ A @ sel^T ; new_X = (sel @ X) * values
    sel = sel_ref[...]
    a_p = _mm_t(_mm(sel, a_ref[...]), sel)
    a_out_ref[...] = a_p
    x_p = _mm(sel, xd_ref[...]) * val_ref[...]
    # next down GCN
    x_out_ref[...] = _mm(_mm(a_p, x_p), dw_ref[...]) + db_ref[...]


def _make_unet_tail_kernel(l_n, unet_dim):
    def kernel(*refs):
        it = iter(refs)
        a_refs = [next(it) for _ in range(l_n)]      # adj_ms (per-level adjacency)
        xd_refs = [next(it) for _ in range(l_n)]     # down_outs
        xs_ref = next(it)                            # org_X / start_gcn_outs
        sel_refs = [next(it) for _ in range(l_n)]    # one-hot pool selections
        val_ref = next(it)                           # top-k scores of the last pool
        bw_ref, bb_ref = next(it), next(it)
        uw_refs = [next(it) for _ in range(l_n)]
        ub_refs = [next(it) for _ in range(l_n)]
        ew_ref, eb_ref = next(it), next(it)
        net_ref = next(it)

        # last pool (gather) + bottom GCN
        sel_last = sel_refs[-1][...]
        a_bot = _mm_t(_mm(sel_last, a_refs[-1][...]), sel_last)
        x = _mm(sel_last, xd_refs[-1][...]) * val_ref[...]
        x = _mm(_mm(a_bot, x), bw_ref[...]) + bb_ref[...]

        # up path: unpool (scatter == sel^T @ x) + up GCN + skip connection
        for i in range(l_n):
            up_idx = l_n - i - 1
            sel = sel_refs[up_idx][...]
            a = a_refs[up_idx][...]
            xu = _tm(sel, x)
            x = _mm(_mm(a, xu), uw_refs[i][...]) + ub_refs[i][...]
            x = x + xd_refs[up_idx][...]

        # end GCN on concat([x, org_X], 1); the concat is folded into the weight:
        #   (A @ [x, xs]) @ W_end = (A @ x) @ W_end[:d] + (A @ xs) @ W_end[d:]
        a0 = a_refs[0][...]
        ew = ew_ref[...]
        net_ref[...] = (_mm(_mm(a0, x), ew[:unet_dim, :])
                        + _mm(_mm(a0, xs_ref[...]), ew[unet_dim:, :])
                        + eb_ref[...])
    return kernel


def _gsr_tail_kernel(w_ref, u_ref, f_ref, g1_ref, b1_ref, w1_ref,
                     g2_ref, b2_ref, w2_ref, out_ref, z_ref, *, lr_dim, eps):
    hr = out_ref.shape[0]
    # diagonal mask built once and reused by all three diag-fills
    ri = jax.lax.broadcasted_iota(jnp.int32, (hr, hr), 0)
    ci = jax.lax.broadcasted_iota(jnp.int32, (hr, hr), 1)
    dmask = ri == ci

    # GSRLayer:  a = W @ [I; I]  ==  W[:, :lr] + W[:, lr:2lr]  (matmul removed)
    w = w_ref[...]
    a = w[:, :lr_dim] + w[:, lr_dim:2 * lr_dim]
    b = _mm_t(a, u_ref[...])                       # a @ U^T
    f_d = jnp.abs(_mm(b, f_ref[...]))
    f_d = jnp.where(dmask, 1.0, f_d)               # fill_diagonal_(1)
    out_ref[...] = f_d                             # "outputs" (HR adjacency)

    x = _mm_t(f_d, f_d)                            # f_d @ f_d^T
    x = (x + x.T) * 0.5
    x = jnp.where(dmask, 1.0, x)
    z0 = jnp.abs(x)                                # Z

    # GraphNorm 1
    # TODO(synk): GraphNorm definition not included in the provided snippet;
    # implemented as per-feature normalization over nodes with learnable affine.
    mean = jnp.mean(z0, axis=0, keepdims=True)
    var = jnp.mean((z0 - mean) ** 2, axis=0, keepdims=True)
    z1 = g1_ref[...] * (z0 - mean) * jax.lax.rsqrt(var + eps) + b1_ref[...]

    # GraphConvolution 1: relu(outputs @ (Z @ W1))
    h1 = jnp.maximum(_mm(f_d, _mm(z1, w1_ref[...])), 0.0)

    # GraphNorm 2
    mean2 = jnp.mean(h1, axis=0, keepdims=True)
    var2 = jnp.mean((h1 - mean2) ** 2, axis=0, keepdims=True)
    h1n = g2_ref[...] * (h1 - mean2) * jax.lax.rsqrt(var2 + eps) + b2_ref[...]

    # GraphConvolution 2: relu(outputs @ (h1 @ W2))
    h2 = jnp.maximum(_mm(f_d, _mm(h1n, w2_ref[...])), 0.0)

    # z = (z + z^T)/2 ; fill_diagonal_(1) ; abs
    zz = (h2 + h2.T) * 0.5
    zz = jnp.where(dmask, 1.0, zz)
    z_ref[...] = jnp.abs(zz)


# ----------------------------------------------------------------------------
# XLA-side pool selection (data-dependent top-k; gather is folded into Pallas
# kernels as a one-hot matmul, so no (n,1) Pallas output / extra launch needed).
# ----------------------------------------------------------------------------
def _pool_select(x, w, b, k):
    n = x.shape[0]
    scores = jax.nn.sigmoid((x @ w + b.reshape(1, -1)) / 100.0)[:, 0]
    kk = max(2, int(k * n))
    values, idx = jax.lax.top_k(scores, kk)
    sel = jax.nn.one_hot(idx, n, dtype=F32)        # (kk, n) selection matrix
    return sel, values.reshape(kk, 1)


# ----------------------------------------------------------------------------
# Full forward
# ----------------------------------------------------------------------------
def eagsrnet_forward(lr, p, ks, lr_dim, hr_dim):
    unet_dim = p['start_w'].shape[1]
    l_n = len(ks)

    # Kernel 1: normalize_adj + start GCN + first down GCN
    A, x_start, x_d = _call(
        _unet_head_kernel,
        (jax.ShapeDtypeStruct((lr_dim, lr_dim), F32),
         jax.ShapeDtypeStruct((lr_dim, unet_dim), F32),
         jax.ShapeDtypeStruct((lr_dim, unet_dim), F32)),
        lr, p['start_w'], p['start_b'].reshape(1, -1),
        p['down_w'][0], p['down_b'][0].reshape(1, -1))

    # TODO(synk): torch.symeig has no Pallas equivalent; eigendecomposition in XLA.
    _, U_lr = jnp.linalg.eigh(A)

    a_list, xd_list, sel_list = [A], [x_d], []
    vals = None
    for i in range(l_n):
        sel, vals = _pool_select(xd_list[i], p['pool_w'][i], p['pool_b'][i], ks[i])
        sel_list.append(sel)
        if i + 1 < l_n:
            kk = sel.shape[0]
            a_next, x_next = _call(
                _unet_down_kernel,
                (jax.ShapeDtypeStruct((kk, kk), F32),
                 jax.ShapeDtypeStruct((kk, unet_dim), F32)),
                a_list[i], xd_list[i], sel, vals,
                p['down_w'][i + 1], p['down_b'][i + 1].reshape(1, -1))
            a_list.append(a_next)
            xd_list.append(x_next)

    # Kernel: last pool + bottom GCN + up path + end GCN
    tail_args = (a_list + xd_list + [x_start] + sel_list + [vals]
                 + [p['bottom_w'], p['bottom_b'].reshape(1, -1)]
                 + [p['up_w'][i] for i in range(l_n)]
                 + [p['up_b'][i].reshape(1, -1) for i in range(l_n)]
                 + [p['end_w'], p['end_b'].reshape(1, -1)])
    net_outs = _call(
        _make_unet_tail_kernel(l_n, unet_dim),
        jax.ShapeDtypeStruct((lr_dim, hr_dim), F32),
        *tail_args)

    # Kernel: GSR + GraphNorm + GraphConv + GraphNorm + GraphConv + symmetrize
    outputs, z = _call(
        functools.partial(_gsr_tail_kernel, lr_dim=lr_dim, eps=1e-5),
        (jax.ShapeDtypeStruct((hr_dim, hr_dim), F32),
         jax.ShapeDtypeStruct((hr_dim, hr_dim), F32)),
        p['gsr_w'], U_lr, net_outs,
        p['gn1_g'].reshape(1, -1), p['gn1_b'].reshape(1, -1), p['gc1_w'],
        p['gn2_g'].reshape(1, -1), p['gn2_b'].reshape(1, -1), p['gc2_w'])

    return z, net_outs, x_start, outputs


# ----------------------------------------------------------------------------
# Deterministic parameter init
# ----------------------------------------------------------------------------
def init_params(key, lr_dim, hr_dim, hidden_dim, unet_dim, ks):
    keys = iter(jax.random.split(key, 64))

    def lin(in_d, out_d):
        s = 1.0 / jnp.sqrt(float(in_d))
        w = jax.random.uniform(next(keys), (in_d, out_d), F32, -s, s)
        b = jax.random.uniform(next(keys), (out_d,), F32, -s, s)
        return w, b

    def xavier(in_d, out_d):
        s = float((6.0 / (in_d + out_d)) ** 0.5)
        return jax.random.uniform(next(keys), (in_d, out_d), F32, -s, s)

    p = {}
    p['start_w'], p['start_b'] = lin(lr_dim, unet_dim)
    p['bottom_w'], p['bottom_b'] = lin(unet_dim, unet_dim)
    p['end_w'], p['end_b'] = lin(2 * unet_dim, hr_dim)
    p['down_w'], p['down_b'], p['up_w'], p['up_b'] = [], [], [], []
    p['pool_w'], p['pool_b'] = [], []
    for _ in ks:
        w, b = lin(unet_dim, unet_dim); p['down_w'].append(w); p['down_b'].append(b)
        w, b = lin(unet_dim, unet_dim); p['up_w'].append(w); p['up_b'].append(b)
        w, b = lin(unet_dim, 1); p['pool_w'].append(w); p['pool_b'].append(b)
    p['gsr_w'] = xavier(hr_dim, hr_dim)
    p['gn1_g'] = jnp.ones((hr_dim,), F32)
    p['gn1_b'] = jnp.zeros((hr_dim,), F32)
    p['gc1_w'] = xavier(hr_dim, hidden_dim)
    p['gn2_g'] = jnp.ones((hidden_dim,), F32)
    p['gn2_b'] = jnp.zeros((hidden_dim,), F32)
    p['gc2_w'] = xavier(hidden_dim, hr_dim)
    return p


if __name__ == "__main__":
    lr_dim, hr_dim, hidden_dim, unet_dim = 16, 32, 32, 32
    ks = (0.75, 0.5)

    key = jax.random.PRNGKey(0)
    k_in, k_param = jax.random.split(key)

    # small symmetric non-negative "LR connectome" input, shape (16, 16)
    x = jax.random.uniform(k_in, (lr_dim, lr_dim), F32)
    lr = (x + x.T) * 0.5

    params = init_params(k_param, lr_dim, hr_dim, hidden_dim, unet_dim, ks)

    fwd = jax.jit(eagsrnet_forward, static_argnums=(2, 3, 4))
    z, net_outs, start_gcn_outs, outputs = fwd(lr, params, ks, lr_dim, hr_dim)
    jax.block_until_ready((z, net_outs, start_gcn_outs, outputs))

    assert z.shape == (hr_dim, hr_dim)
    assert net_outs.shape == (lr_dim, hr_dim)
    assert start_gcn_outs.shape == (lr_dim, unet_dim)
    assert outputs.shape == (hr_dim, hr_dim)
    print("KERNEL_OK")
</pallas_src>

<mosaic_0001>
module attributes {stable_mosaic.version = 11 : i64} {
  func.func @_unet_head_kernel(%arg0: memref<16x16xf32, #tpu.memory_space<vmem>>, %arg1: memref<16x32xf32, #tpu.memory_space<vmem>>, %arg2: memref<1x32xf32, #tpu.memory_space<vmem>>, %arg3: memref<32x32xf32, #tpu.memory_space<vmem>>, %arg4: memref<1x32xf32, #tpu.memory_space<vmem>>, %arg5: memref<16x16xf32, #tpu.memory_space<vmem>>, %arg6: memref<16x32xf32, #tpu.memory_space<vmem>>, %arg7: memref<16x32xf32, #tpu.memory_space<vmem>>) attributes {dimension_semantics = [], scalar_prefetch = 0 : i64, scratch_operands = 0 : i64, tpu.core_type = #tpu.core_type<tc>} {
    %c0 = arith.constant 0 : index
    %c0_0 = arith.constant 0 : index
    %0 = vector.load %arg0[%c0, %c0_0] : memref<16x16xf32, #tpu.memory_space<vmem>>, vector<16x16xf32>
    %cst = arith.constant dense<0.000000e+00> : vector<16xf32>
    %1 = vector.multi_reduction <add>, %0, %cst [1] : vector<16x16xf32> to vector<16xf32>
    %2 = vector.shape_cast %1 : vector<16xf32> to vector<16x1xf32>
    %3 = math.rsqrt %2 : vector<16x1xf32>
    %4 = math.absf %3 : vector<16x1xf32>
    %cst_1 = arith.constant 0x7F800000 : f32
    %5 = vector.broadcast %cst_1 : f32 to vector<16x1xf32>
    %6 = arith.cmpf oeq, %4, %5 : vector<16x1xf32>
    %cst_2 = arith.constant 0.000000e+00 : f32
    %7 = vector.broadcast %cst_2 : f32 to vector<16x1xf32>
    %8 = arith.select %6, %7, %3 : vector<16x1xi1>, vector<16x1xf32>
    %9 = tpu.transpose %0, [1, 0] : vector<16x16xf32> -> vector<16x16xf32>
    %10 = vector.broadcast %8 : vector<16x1xf32> to vector<16x16xf32>
    %11 = arith.mulf %9, %10 : vector<16x16xf32>
    %12 = tpu.transpose %8, [1, 0] : vector<16x1xf32> -> vector<1x16xf32>
    %13 = vector.broadcast %12 : vector<1x16xf32> to vector<16x16xf32>
    %14 = arith.mulf %11, %13 : vector<16x16xf32>
    %c0_3 = arith.constant 0 : index
    %c0_4 = arith.constant 0 : index
    %15 = vector.load %arg5[%c0_3, %c0_4] : memref<16x16xf32, #tpu.memory_space<vmem>>, vector<16x16xf32>
    tpu.vector_store %arg5[%c0_3, %c0_4], %14 {strides = array<i32>} : memref<16x16xf32, #tpu.memory_space<vmem>>, vector<16x16xf32>,
    %c0_5 = arith.constant 0 : index
    %c0_6 = arith.constant 0 : index
    %16 = vector.load %arg1[%c0_5, %c0_6] : memref<16x32xf32, #tpu.memory_space<vmem>>, vector<16x32xf32>
    %cst_7 = arith.constant dense<0.000000e+00> : vector<16x32xf32>
    %17 = tpu.matmul %14, %16, %cst_7 {dimension_numbers = #tpu.dot_dimension_numbers<[1], [0], [0], [1], [0, 0, 1, 1], [], []>} : vector<16x16xf32>, vector<16x32xf32>, vector<16x32xf32> -> vector<16x32xf32>
    %c0_8 = arith.constant 0 : index
    %c0_9 = arith.constant 0 : index
    %18 = vector.load %arg2[%c0_8, %c0_9] : memref<1x32xf32, #tpu.memory_space<vmem>>, vector<1x32xf32>
    %19 = vector.broadcast %18 : vector<1x32xf32> to vector<16x32xf32>
    %20 = arith.addf %17, %19 : vector<16x32xf32>
    %c0_10 = arith.constant 0 : index
    %c0_11 = arith.constant 0 : index
    %21 = vector.load %arg6[%c0_10, %c0_11] : memref<16x32xf32, #tpu.memory_space<vmem>>, vector<16x32xf32>
    tpu.vector_store %arg6[%c0_10, %c0_11], %20 {strides = array<i32>} : memref<16x32xf32, #tpu.memory_space<vmem>>, vector<16x32xf32>,
    %cst_12 = arith.constant dense<0.000000e+00> : vector<16x32xf32>
    %22 = tpu.matmul %14, %20, %cst_12 {dimension_numbers = #tpu.dot_dimension_numbers<[1], [0], [0], [1], [0, 0, 1, 1], [], []>} : vector<16x16xf32>, vector<16x32xf32>, vector<16x32xf32> -> vector<16x32xf32>
    %c0_13 = arith.constant 0 : index
    %c0_14 = arith.constant 0 : index
    %23 = vector.load %arg3[%c0_13, %c0_14] : memref<32x32xf32, #tpu.memory_space<vmem>>, vector<32x32xf32>
    %cst_15 = arith.constant dense<0.000000e+00> : vector<16x32xf32>
    %24 = tpu.matmul %22, %23, %cst_15 {dimension_numbers = #tpu.dot_dimension_numbers<[1], [0], [0], [1], [0, 0, 1, 1], [], []>} : vector<16x32xf32>, vector<32x32xf32>, vector<16x32xf32> -> vector<16x32xf32>
    %c0_16 = arith.constant 0 : index
    %c0_17 = arith.constant 0 : index
    %25 = vector.load %arg4[%c0_16, %c0_17] : memref<1x32xf32, #tpu.memory_space<vmem>>, vector<1x32xf32>
    %26 = vector.broadcast %25 : vector<1x32xf32> to vector<16x32xf32>
    %27 = arith.addf %24, %26 : vector<16x32xf32>
    %c0_18 = arith.constant 0 : index
    %c0_19 = arith.constant 0 : index
    %28 = vector.load %arg7[%c0_18, %c0_19] : memref<16x32xf32, #tpu.memory_space<vmem>>, vector<16x32xf32>
    tpu.vector_store %arg7[%c0_18, %c0_19], %27 {strides = array<i32>} : memref<16x32xf32, #tpu.memory_space<vmem>>, vector<16x32xf32>,
    return
  }
}

module attributes {stable_mosaic.version = 11 : i64} {
  func.func @_unet_down_kernel(%arg0: memref<16x16xf32, #tpu.memory_space<vmem>>, %arg1: memref<16x32xf32, #tpu.memory_space<vmem>>, %arg2: memref<12x16xf32, #tpu.memory_space<vmem>>, %arg3: memref<12x1xf32, #tpu.memory_space<vmem>>, %arg4: memref<32x32xf32, #tpu.memory_space<vmem>>, %arg5: memref<1x32xf32, #tpu.memory_space<vmem>>, %arg6: memref<12x12xf32, #tpu.memory_space<vmem>>, %arg7: memref<12x32xf32, #tpu.memory_space<vmem>>) attributes {dimension_semantics = [], scalar_prefetch = 0 : i64, scratch_operands = 0 : i64, tpu.core_type = #tpu.core_type<tc>} {
    %c0 = arith.constant 0 : index
    %c0_0 = arith.constant 0 : index
    %0 = vector.load %arg2[%c0, %c0_0] : memref<12x16xf32, #tpu.memory_space<vmem>>, vector<12x16xf32>
    %c0_1 = arith.constant 0 : index
    %c0_2 = arith.constant 0 : index
    %1 = vector.load %arg0[%c0_1, %c0_2] : memref<16x16xf32, #tpu.memory_space<vmem>>, vector<16x16xf32>
    %cst = arith.constant dense<0.000000e+00> : vector<12x16xf32>
    %2 = tpu.matmul %0, %1, %cst {dimension_numbers = #tpu.dot_dimension_numbers<[1], [0], [0], [1], [0, 0, 1, 1], [], []>} : vector<12x16xf32>, vector<16x16xf32>, vector<12x16xf32> -> vector<12x16xf32>
    %cst_3 = arith.constant dense<0.000000e+00> : vector<12x12xf32>
    %3 = tpu.matmul %2, %0, %cst_3 {dimension_numbers = #tpu.dot_dimension_numbers<[1], [1], [0], [0], [0, 0, 1, 0], [], []>} : vector<12x16xf32>, vector<12x16xf32>, vector<12x12xf32> -> vector<12x12xf32>
    %c0_4 = arith.constant 0 : index
    %c0_5 = arith.constant 0 : index
    %4 = vector.load %arg6[%c0_4, %c0_5] : memref<12x12xf32, #tpu.memory_space<vmem>>, vector<12x12xf32>
    tpu.vector_store %arg6[%c0_4, %c0_5], %3 {strides = array<i32>} : memref<12x12xf32, #tpu.memory_space<vmem>>, vector<12x12xf32>,
    %c0_6 = arith.constant 0 : index
    %c0_7 = arith.constant 0 : index
    %5 = vector.load %arg1[%c0_6, %c0_7] : memref<16x32xf32, #tpu.memory_space<vmem>>, vector<16x32xf32>
    %cst_8 = arith.constant dense<0.000000e+00> : vector<12x32xf32>
    %6 = tpu.matmul %0, %5, %cst_8 {dimension_numbers = #tpu.dot_dimension_numbers<[1], [0], [0], [1], [0, 0, 1, 1], [], []>} : vector<12x16xf32>, vector<16x32xf32>, vector<12x32xf32> -> vector<12x32xf32>
    %c0_9 = arith.constant 0 : index
    %c0_10 = arith.constant 0 : index
    %7 = vector.load %arg3[%c0_9, %c0_10] : memref<12x1xf32, #tpu.memory_space<vmem>>, vector<12x1xf32>
    %8 = vector.broadcast %7 : vector<12x1xf32> to vector<12x32xf32>
    %9 = arith.mulf %6, %8 : vector<12x32xf32>
    %cst_11 = arith.constant dense<0.000000e+00> : vector<12x32xf32>
    %10 = tpu.matmul %3, %9, %cst_11 {dimension_numbers = #tpu.dot_dimension_numbers<[1], [0], [0], [1], [0, 0, 1, 1], [], []>} : vector<12x12xf32>, vector<12x32xf32>, vector<12x32xf32> -> vector<12x32xf32>
    %c0_12 = arith.constant 0 : index
    %c0_13 = arith.constant 0 : index
    %11 = vector.load %arg4[%c0_12, %c0_13] : memref<32x32xf32, #tpu.memory_space<vmem>>, vector<32x32xf32>
    %cst_14 = arith.constant dense<0.000000e+00> : vector<12x32xf32>
    %12 = tpu.matmul %10, %11, %cst_14 {dimension_numbers = #tpu.dot_dimension_numbers<[1], [0], [0], [1], [0, 0, 1, 1], [], []>} : vector<12x32xf32>, vector<32x32xf32>, vector<12x32xf32> -> vector<12x32xf32>
    %c0_15 = arith.constant 0 : index
    %c0_16 = arith.constant 0 : index
    %13 = vector.load %arg5[%c0_15, %c0_16] : memref<1x32xf32, #tpu.memory_space<vmem>>, vector<1x32xf32>
    %14 = vector.broadcast %13 : vector<1x32xf32> to vector<12x32xf32>
    %15 = arith.addf %12, %14 : vector<12x32xf32>
    %c0_17 = arith.constant 0 : index
    %c0_18 = arith.constant 0 : index
    %16 = vector.load %arg7[%c0_17, %c0_18] : memref<12x32xf32, #tpu.memory_space<vmem>>, vector<12x32xf32>
    tpu.vector_store %arg7[%c0_17, %c0_18], %15 {strides = array<i32>} : memref<12x32xf32, #tpu.memory_space<vmem>>, vector<12x32xf32>,
    return
  }
}

module attributes {stable_mosaic.version = 11 : i64} {
  func.func @kernel(%arg0: memref<16x16xf32, #tpu.memory_space<vmem>>, %arg1: memref<12x12xf32, #tpu.memory_space<vmem>>, %arg2: memref<16x32xf32, #tpu.memory_space<vmem>>, %arg3: memref<12x32xf32, #tpu.memory_space<vmem>>, %arg4: memref<16x32xf32, #tpu.memory_space<vmem>>, %arg5: memref<12x16xf32, #tpu.memory_space<vmem>>, %arg6: memref<6x12xf32, #tpu.memory_space<vmem>>, %arg7: memref<6x1xf32, #tpu.memory_space<vmem>>, %arg8: memref<32x32xf32, #tpu.memory_space<vmem>>, %arg9: memref<1x32xf32, #tpu.memory_space<vmem>>, %arg10: memref<32x32xf32, #tpu.memory_space<vmem>>, %arg11: memref<32x32xf32, #tpu.memory_space<vmem>>, %arg12: memref<1x32xf32, #tpu.memory_space<vmem>>, %arg13: memref<1x32xf32, #tpu.memory_space<vmem>>, %arg14: memref<64x32xf32, #tpu.memory_space<vmem>>, %arg15: memref<1x32xf32, #tpu.memory_space<vmem>>, %arg16: memref<16x32xf32, #tpu.memory_space<vmem>>) attributes {dimension_semantics = [], scalar_prefetch = 0 : i64, scratch_operands = 0 : i64, tpu.core_type = #tpu.core_type<tc>} {
    %c0 = arith.constant 0 : index
    %c0_0 = arith.constant 0 : index
    %0 = vector.load %arg6[%c0, %c0_0] : memref<6x12xf32, #tpu.memory_space<vmem>>, vector<6x12xf32>
    %c0_1 = arith.constant 0 : index
    %c0_2 = arith.constant 0 : index
    %1 = vector.load %arg1[%c0_1, %c0_2] : memref<12x12xf32, #tpu.memory_space<vmem>>, vector<12x12xf32>
    %cst = arith.constant dense<0.000000e+00> : vector<6x12xf32>
    %2 = tpu.matmul %0, %1, %cst {dimension_numbers = #tpu.dot_dimension_numbers<[1], [0], [0], [1], [0, 0, 1, 1], [], []>} : vector<6x12xf32>, vector<12x12xf32>, vector<6x12xf32> -> vector<6x12xf32>
    %cst_3 = arith.constant dense<0.000000e+00> : vector<6x6xf32>
    %3 = tpu.matmul %2, %0, %cst_3 {dimension_numbers = #tpu.dot_dimension_numbers<[1], [1], [0], [0], [0, 0, 1, 0], [], []>} : vector<6x12xf32>, vector<6x12xf32>, vector<6x6xf32> -> vector<6x6xf32>
    %c0_4 = arith.constant 0 : index
    %c0_5 = arith.constant 0 : index
    %4 = vector.load %arg3[%c0_4, %c0_5] : memref<12x32xf32, #tpu.memory_space<vmem>>, vector<12x32xf32>
    %cst_6 = arith.constant dense<0.000000e+00> : vector<6x32xf32>
    %5 = tpu.matmul %0, %4, %cst_6 {dimension_numbers = #tpu.dot_dimension_numbers<[1], [0], [0], [1], [0, 0, 1, 1], [], []>} : vector<6x12xf32>, vector<12x32xf32>, vector<6x32xf32> -> vector<6x32xf32>
    %c0_7 = arith.constant 0 : index
    %c0_8 = arith.constant 0 : index
    %6 = vector.load %arg7[%c0_7, %c0_8] : memref<6x1xf32, #tpu.memory_space<vmem>>, vector<6x1xf32>
    %7 = vector.broadcast %6 : vector<6x1xf32> to vector<6x32xf32>
    %8 = arith.mulf %5, %7 : vector<6x32xf32>
    %cst_9 = arith.constant dense<0.000000e+00> : vector<6x32xf32>
    %9 = tpu.matmul %3, %8, %cst_9 {dimension_numbers = #tpu.dot_dimension_numbers<[1], [0], [0], [1], [0, 0, 1, 1], [], []>} : vector<6x6xf32>, vector<6x32xf32>, vector<6x32xf32> -> vector<6x32xf32>
    %c0_10 = arith.constant 0 : index
    %c0_11 = arith.constant 0 : index
    %10 = vector.load %arg8[%c0_10, %c0_11] : memref<32x32xf32, #tpu.memory_space<vmem>>, vector<32x32xf32>
    %cst_12 = arith.constant dense<0.000000e+00> : vector<6x32xf32>
    %11 = tpu.matmul %9, %10, %cst_12 {dimension_numbers = #tpu.dot_dimension_numbers<[1], [0], [0], [1], [0, 0, 1, 1], [], []>} : vector<6x32xf32>, vector<32x32xf32>, vector<6x32xf32> -> vector<6x32xf32>
    %c0_13 = arith.constant 0 : index
    %c0_14 = arith.constant 0 : index
    %12 = vector.load %arg9[%c0_13, %c0_14] : memref<1x32xf32, #tpu.memory_space<vmem>>, vector<1x32xf32>
    %13 = vector.broadcast %12 : vector<1x32xf32> to vector<6x32xf32>
    %14 = arith.addf %11, %13 : vector<6x32xf32>
    %c0_15 = arith.constant 0 : index
    %c0_16 = arith.constant 0 : index
    %15 = vector.load %arg6[%c0_15, %c0_16] : memref<6x12xf32, #tpu.memory_space<vmem>>, vector<6x12xf32>
    %c0_17 = arith.constant 0 : index
    %c0_18 = arith.constant 0 : index
    %16 = vector.load %arg1[%c0_17, %c0_18] : memref<12x12xf32, #tpu.memory_space<vmem>>, vector<12x12xf32>
    %cst_19 = arith.constant dense<0.000000e+00> : vector<12x32xf32>
    %17 = tpu.matmul %15, %14, %cst_19 {dimension_numbers = #tpu.dot_dimension_numbers<[0], [0], [1], [1], [0, 1, 1, 1], [], []>} : vector<6x12xf32>, vector<6x32xf32>, vector<12x32xf32> -> vector<12x32xf32>
    %cst_20 = arith.constant dense<0.000000e+00> : vector<12x32xf32>
    %18 = tpu.matmul %16, %17, %cst_20 {dimension_numbers = #tpu.dot_dimension_numbers<[1], [0], [0], [1], [0, 0, 1, 1], [], []>} : vector<12x12xf32>, vector<12x32xf32>, vector<12x32xf32> -> vector<12x32xf32>
    %c0_21 = arith.constant 0 : index
    %c0_22 = arith.constant 0 : index
    %19 = vector.load %arg10[%c0_21, %c0_22] : memref<32x32xf32, #tpu.memory_space<vmem>>, vector<32x32xf32>
    %cst_23 = arith.constant dense<0.000000e+00> : vector<12x32xf32>
    %20 = tpu.matmul %18, %19, %cst_23 {dimension_numbers = #tpu.dot_dimension_numbers<[1], [0], [0], [1], [0, 0, 1, 1], [], []>} : vector<12x32xf32>, vector<32x32xf32>, vector<12x32xf32> -> vector<12x32xf32>
    %c0_24 = arith.constant 0 : index
    %c0_25 = arith.constant 0 : index
    %21 = vector.load %arg12[%c0_24, %c0_25] : memref<1x32xf32, #tpu.memory_space<vmem>>, vector<1x32xf32>
    %22 = vector.broadcast %21 : vector<1x32xf32> to vector<12x32xf32>
    %23 = arith.addf %20, %22 : vector<12x32xf32>
    %c0_26 = arith.constant 0 : index
    %c0_27 = arith.constant 0 : index
    %24 = vector.load %arg3[%c0_26, %c0_27] : memref<12x32xf32, #tpu.memory_space<vmem>>, vector<12x32xf32>
    %25 = arith.addf %23, %24 : vector<12x32xf32>
    %c0_28 = arith.constant 0 : index
    %c0_29 = arith.constant 0 : index
    %26 = vector.load %arg5[%c0_28, %c0_29] : memref<12x16xf32, #tpu.memory_space<vmem>>, vector<12x16xf32>
    %c0_30 = arith.constant 0 : index
    %c0_31 = arith.constant 0 : index
    %27 = vector.load %arg0[%c0_30, %c0_31] : memref<16x16xf32, #tpu.memory_space<vmem>>, vector<16x16xf32>
    %cst_32 = arith.constant dense<0.000000e+00> : vector<16x32xf32>
    %28 = tpu.matmul %26, %25, %cst_32 {dimension_numbers = #tpu.dot_dimension_numbers<[0], [0], [1], [1], [0, 1, 1, 1], [], []>} : vector<12x16xf32>, vector<12x32xf32>, vector<16x32xf32> -> vector<16x32xf32>
    %cst_33 = arith.constant dense<0.000000e+00> : vector<16x32xf32>
    %29 = tpu.matmul %27, %28, %cst_33 {dimension_numbers = #tpu.dot_dimension_numbers<[1], [0], [0], [1], [0, 0, 1, 1], [], []>} : vector<16x16xf32>, vector<16x32xf32>, vector<16x32xf32> -> vector<16x32xf32>
    %c0_34 = arith.constant 0 : index
    %c0_35 = arith.constant 0 : index
    %30 = vector.load %arg11[%c0_34, %c0_35] : memref<32x32xf32, #tpu.memory_space<vmem>>, vector<32x32xf32>
    %cst_36 = arith.constant dense<0.000000e+00> : vector<16x32xf32>
    %31 = tpu.matmul %29, %30, %cst_36 {dimension_numbers = #tpu.dot_dimension_numbers<[1], [0], [0], [1], [0, 0, 1, 1], [], []>} : vector<16x32xf32>, vector<32x32xf32>, vector<16x32xf32> -> vector<16x32xf32>
    %c0_37 = arith.constant 0 : index
    %c0_38 = arith.constant 0 : index
    %32 = vector.load %arg13[%c0_37, %c0_38] : memref<1x32xf32, #tpu.memory_space<vmem>>, vector<1x32xf32>
    %33 = vector.broadcast %32 : vector<1x32xf32> to vector<16x32xf32>
    %34 = arith.addf %31, %33 : vector<16x32xf32>
    %c0_39 = arith.constant 0 : index
    %c0_40 = arith.constant 0 : index
    %35 = vector.load %arg2[%c0_39, %c0_40] : memref<16x32xf32, #tpu.memory_space<vmem>>, vector<16x32xf32>
    %36 = arith.addf %34, %35 : vector<16x32xf32>
    %c0_41 = arith.constant 0 : index
    %c0_42 = arith.constant 0 : index
    %37 = vector.load %arg0[%c0_41, %c0_42] : memref<16x16xf32, #tpu.memory_space<vmem>>, vector<16x16xf32>
    %c0_43 = arith.constant 0 : index
    %c0_44 = arith.constant 0 : index
    %38 = vector.load %arg14[%c0_43, %c0_44] : memref<64x32xf32, #tpu.memory_space<vmem>>, vector<64x32xf32>
    %cst_45 = arith.constant dense<0.000000e+00> : vector<16x32xf32>
    %39 = tpu.matmul %37, %36, %cst_45 {dimension_numbers = #tpu.dot_dimension_numbers<[1], [0], [0], [1], [0, 0, 1, 1], [], []>} : vector<16x16xf32>, vector<16x32xf32>, vector<16x32xf32> -> vector<16x32xf32>
    %40 = vector.extract_strided_slice %38 {offsets = [0, 0], sizes = [32, 32], strides = [1, 1]} : vector<64x32xf32> to vector<32x32xf32>
    %cst_46 = arith.constant dense<0.000000e+00> : vector<16x32xf32>
    %41 = tpu.matmul %39, %40, %cst_46 {dimension_numbers = #tpu.dot_dimension_numbers<[1], [0], [0], [1], [0, 0, 1, 1], [], []>} : vector<16x32xf32>, vector<32x32xf32>, vector<16x32xf32> -> vector<16x32xf32>
    %c0_47 = arith.constant 0 : index
    %c0_48 = arith.constant 0 : index
    %42 = vector.load %arg4[%c0_47, %c0_48] : memref<16x32xf32, #tpu.memory_space<vmem>>, vector<16x32xf32>
    %cst_49 = arith.constant dense<0.000000e+00> : vector<16x32xf32>
    %43 = tpu.matmul %37, %42, %cst_49 {dimension_numbers = #tpu.dot_dimension_numbers<[1], [0], [0], [1], [0, 0, 1, 1], [], []>} : vector<16x16xf32>, vector<16x32xf32>, vector<16x32xf32> -> vector<16x32xf32>
    %44 = vector.extract_strided_slice %38 {offsets = [32, 0], sizes = [32, 32], strides = [1, 1]} : vector<64x32xf32> to vector<32x32xf32>
    %cst_50 = arith.constant dense<0.000000e+00> : vector<16x32xf32>
    %45 = tpu.matmul %43, %44, %cst_50 {dimension_numbers = #tpu.dot_dimension_numbers<[1], [0], [0], [1], [0, 0, 1, 1], [], []>} : vector<16x32xf32>, vector<32x32xf32>, vector<16x32xf32> -> vector<16x32xf32>
    %46 = arith.addf %41, %45 : vector<16x32xf32>
    %c0_51 = arith.constant 0 : index
    %c0_52 = arith.constant 0 : index
    %47 = vector.load %arg15[%c0_51, %c0_52] : memref<1x32xf32, #tpu.memory_space<vmem>>, vector<1x32xf32>
    %48 = vector.broadcast %47 : vector<1x32xf32> to vector<16x32xf32>
    %49 = arith.addf %46, %48 : vector<16x32xf32>
    %c0_53 = arith.constant 0 : index
    %c0_54 = arith.constant 0 : index
    %50 = vector.load %arg16[%c0_53, %c0_54] : memref<16x32xf32, #tpu.memory_space<vmem>>, vector<16x32xf32>
    tpu.vector_store %arg16[%c0_53, %c0_54], %49 {strides = array<i32>} : memref<16x32xf32, #tpu.memory_space<vmem>>, vector<16x32xf32>,
    return
  }
}

module attributes {stable_mosaic.version = 11 : i64} {
  func.func @_gsr_tail_kernel(%arg0: memref<32x32xf32, #tpu.memory_space<vmem>>, %arg1: memref<16x16xf32, #tpu.memory_space<vmem>>, %arg2: memref<16x32xf32, #tpu.memory_space<vmem>>, %arg3: memref<1x32xf32, #tpu.memory_space<vmem>>, %arg4: memref<1x32xf32, #tpu.memory_space<vmem>>, %arg5: memref<32x32xf32, #tpu.memory_space<vmem>>, %arg6: memref<1x32xf32, #tpu.memory_space<vmem>>, %arg7: memref<1x32xf32, #tpu.memory_space<vmem>>, %arg8: memref<32x32xf32, #tpu.memory_space<vmem>>, %arg9: memref<32x32xf32, #tpu.memory_space<vmem>>, %arg10: memref<32x32xf32, #tpu.memory_space<vmem>>) attributes {dimension_semantics = [], scalar_prefetch = 0 : i64, scratch_operands = 0 : i64, tpu.core_type = #tpu.core_type<tc>} {
    %0 = tpu.iota {dimensions = array<i32: 0>} : vector<32x32xi32>
    %1 = tpu.iota {dimensions = array<i32: 1>} : vector<32x32xi32>
    %2 = arith.cmpi eq, %0, %1 : vector<32x32xi32>
    %c0 = arith.constant 0 : index
    %c0_0 = arith.constant 0 : index
    %3 = vector.load %arg0[%c0, %c0_0] : memref<32x32xf32, #tpu.memory_space<vmem>>, vector<32x32xf32>
    %4 = vector.extract_strided_slice %3 {offsets = [0, 0], sizes = [32, 16], strides = [1, 1]} : vector<32x32xf32> to vector<32x16xf32>
    %5 = vector.extract_strided_slice %3 {offsets = [0, 16], sizes = [32, 16], strides = [1, 1]} : vector<32x32xf32> to vector<32x16xf32>
    %6 = arith.addf %4, %5 : vector<32x16xf32>
    %c0_1 = arith.constant 0 : index
    %c0_2 = arith.constant 0 : index
    %7 = vector.load %arg1[%c0_1, %c0_2] : memref<16x16xf32, #tpu.memory_space<vmem>>, vector<16x16xf32>
    %cst = arith.constant dense<0.000000e+00> : vector<32x16xf32>
    %8 = tpu.matmul %6, %7, %cst {dimension_numbers = #tpu.dot_dimension_numbers<[1], [1], [0], [0], [0, 0, 1, 0], [], []>} : vector<32x16xf32>, vector<16x16xf32>, vector<32x16xf32> -> vector<32x16xf32>
    %c0_3 = arith.constant 0 : index
    %c0_4 = arith.constant 0 : index
    %9 = vector.load %arg2[%c0_3, %c0_4] : memref<16x32xf32, #tpu.memory_space<vmem>>, vector<16x32xf32>
    %cst_5 = arith.constant dense<0.000000e+00> : vector<32x32xf32>
    %10 = tpu.matmul %8, %9, %cst_5 {dimension_numbers = #tpu.dot_dimension_numbers<[1], [0], [0], [1], [0, 0, 1, 1], [], []>} : vector<32x16xf32>, vector<16x32xf32>, vector<32x32xf32> -> vector<32x32xf32>
    %11 = math.absf %10 : vector<32x32xf32>
    %cst_6 = arith.constant 1.000000e+00 : f32
    %12 = vector.broadcast %cst_6 : f32 to vector<32x32xf32>
    %13 = arith.select %2, %12, %11 : vector<32x32xi1>, vector<32x32xf32>
    %c0_7 = arith.constant 0 : index
    %c0_8 = arith.constant 0 : index
    %14 = vector.load %arg9[%c0_7, %c0_8] : memref<32x32xf32, #tpu.memory_space<vmem>>, vector<32x32xf32>
    tpu.vector_store %arg9[%c0_7, %c0_8], %13 {strides = array<i32>} : memref<32x32xf32, #tpu.memory_space<vmem>>, vector<32x32xf32>,
    %cst_9 = arith.constant dense<0.000000e+00> : vector<32x32xf32>
    %15 = tpu.matmul %13, %13, %cst_9 {dimension_numbers = #tpu.dot_dimension_numbers<[1], [1], [0], [0], [0, 0, 1, 0], [], []>} : vector<32x32xf32>, vector<32x32xf32>, vector<32x32xf32> -> vector<32x32xf32>
    %16 = tpu.transpose %15, [1, 0] : vector<32x32xf32> -> vector<32x32xf32>
    %17 = arith.addf %15, %16 : vector<32x32xf32>
    %cst_10 = arith.constant 5.000000e-01 : f32
    %18 = vector.broadcast %cst_10 : f32 to vector<32x32xf32>
    %19 = arith.mulf %17, %18 : vector<32x32xf32>
    %cst_11 = arith.constant 1.000000e+00 : f32
    %20 = vector.broadcast %cst_11 : f32 to vector<32x32xf32>
    %21 = arith.select %2, %20, %19 : vector<32x32xi1>, vector<32x32xf32>
    %22 = math.absf %21 : vector<32x32xf32>
    %cst_12 = arith.constant dense<0.000000e+00> : vector<32xf32>
    %23 = vector.multi_reduction <add>, %22, %cst_12 [0] : vector<32x32xf32> to vector<32xf32>
    %24 = vector.shape_cast %23 : vector<32xf32> to vector<1x32xf32>
    %cst_13 = arith.constant 3.200000e+01 : f32
    %25 = vector.broadcast %cst_13 : f32 to vector<1x32xf32>
    %26 = arith.divf %24, %25 : vector<1x32xf32>
    %27 = vector.broadcast %26 : vector<1x32xf32> to vector<32x32xf32>
    %28 = arith.subf %22, %27 : vector<32x32xf32>
    %29 = arith.mulf %28, %28 : vector<32x32xf32>
    %cst_14 = arith.constant dense<0.000000e+00> : vector<32xf32>
    %30 = vector.multi_reduction <add>, %29, %cst_14 [0] : vector<32x32xf32> to vector<32xf32>
    %31 = vector.shape_cast %30 : vector<32xf32> to vector<1x32xf32>
    %cst_15 = arith.constant 3.200000e+01 : f32
    %32 = vector.broadcast %cst_15 : f32 to vector<1x32xf32>
    %33 = arith.divf %31, %32 : vector<1x32xf32>
    %c0_16 = arith.constant 0 : index
    %c0_17 = arith.constant 0 : index
    %34 = vector.load %arg3[%c0_16, %c0_17] : memref<1x32xf32, #tpu.memory_space<vmem>>, vector<1x32xf32>
    %35 = vector.broadcast %26 : vector<1x32xf32> to vector<32x32xf32>
    %36 = arith.subf %22, %35 : vector<32x32xf32>
    %37 = vector.broadcast %34 : vector<1x32xf32> to vector<32x32xf32>
    %38 = arith.mulf %37, %36 : vector<32x32xf32>
    %cst_18 = arith.constant 9.99999974E-6 : f32
    %39 = vector.broadcast %cst_18 : f32 to vector<1x32xf32>
    %40 = arith.addf %33, %39 : vector<1x32xf32>
    %41 = math.rsqrt %40 : vector<1x32xf32>
    %42 = vector.broadcast %41 : vector<1x32xf32> to vector<32x32xf32>
    %43 = arith.mulf %38, %42 : vector<32x32xf32>
    %c0_19 = arith.constant 0 : index
    %c0_20 = arith.constant 0 : index
    %44 = vector.load %arg4[%c0_19, %c0_20] : memref<1x32xf32, #tpu.memory_space<vmem>>, vector<1x32xf32>
    %45 = vector.broadcast %44 : vector<1x32xf32> to vector<32x32xf32>
    %46 = arith.addf %43, %45 : vector<32x32xf32>
    %c0_21 = arith.constant 0 : index
    %c0_22 = arith.constant 0 : index
    %47 = vector.load %arg5[%c0_21, %c0_22] : memref<32x32xf32, #tpu.memory_space<vmem>>, vector<32x32xf32>
    %cst_23 = arith.constant dense<0.000000e+00> : vector<32x32xf32>
    %48 = tpu.matmul %46, %47, %cst_23 {dimension_numbers = #tpu.dot_dimension_numbers<[1], [0], [0], [1], [0, 0, 1, 1], [], []>} : vector<32x32xf32>, vector<32x32xf32>, vector<32x32xf32> -> vector<32x32xf32>
    %cst_24 = arith.constant dense<0.000000e+00> : vector<32x32xf32>
    %49 = tpu.matmul %13, %48, %cst_24 {dimension_numbers = #tpu.dot_dimension_numbers<[1], [0], [0], [1], [0, 0, 1, 1], [], []>} : vector<32x32xf32>, vector<32x32xf32>, vector<32x32xf32> -> vector<32x32xf32>
    %cst_25 = arith.constant 0.000000e+00 : f32
    %50 = vector.broadcast %cst_25 : f32 to vector<32x32xf32>
    %51 = arith.maximumf %49, %50 : vector<32x32xf32>
    %cst_26 = arith.constant dense<0.000000e+00> : vector<32xf32>
    %52 = vector.multi_reduction <add>, %51, %cst_26 [0] : vector<32x32xf32> to vector<32xf32>
    %53 = vector.shape_cast %52 : vector<32xf32> to vector<1x32xf32>
    %cst_27 = arith.constant 3.200000e+01 : f32
    %54 = vector.broadcast %cst_27 : f32 to vector<1x32xf32>
    %55 = arith.divf %53, %54 : vector<1x32xf32>
    %56 = vector.broadcast %55 : vector<1x32xf32> to vector<32x32xf32>
    %57 = arith.subf %51, %56 : vector<32x32xf32>
    %58 = arith.mulf %57, %57 : vector<32x32xf32>
    %cst_28 = arith.constant dense<0.000000e+00> : vector<32xf32>
    %59 = vector.multi_reduction <add>, %58, %cst_28 [0] : vector<32x32xf32> to vector<32xf32>
    %60 = vector.shape_cast %59 : vector<32xf32> to vector<1x32xf32>
    %cst_29 = arith.constant 3.200000e+01 : f32
    %61 = vector.broadcast %cst_29 : f32 to vector<1x32xf32>
    %62 = arith.divf %60, %61 : vector<1x32xf32>
    %c0_30 = arith.constant 0 : index
    %c0_31 = arith.constant 0 : index
    %63 = vector.load %arg6[%c0_30, %c0_31] : memref<1x32xf32, #tpu.memory_space<vmem>>, vector<1x32xf32>
    %64 = vector.broadcast %55 : vector<1x32xf32> to vector<32x32xf32>
    %65 = arith.subf %51, %64 : vector<32x32xf32>
    %66 = vector.broadcast %63 : vector<1x32xf32> to vector<32x32xf32>
    %67 = arith.mulf %66, %65 : vector<32x32xf32>
    %cst_32 = arith.constant 9.99999974E-6 : f32
    %68 = vector.broadcast %cst_32 : f32 to vector<1x32xf32>
    %69 = arith.addf %62, %68 : vector<1x32xf32>
    %70 = math.rsqrt %69 : vector<1x32xf32>
    %71 = vector.broadcast %70 : vector<1x32xf32> to vector<32x32xf32>
    %72 = arith.mulf %67, %71 : vector<32x32xf32>
    %c0_33 = arith.constant 0 : index
    %c0_34 = arith.constant 0 : index
    %73 = vector.load %arg7[%c0_33, %c0_34] : memref<1x32xf32, #tpu.memory_space<vmem>>, vector<1x32xf32>
    %74 = vector.broadcast %73 : vector<1x32xf32> to vector<32x32xf32>
    %75 = arith.addf %72, %74 : vector<32x32xf32>
    %c0_35 = arith.constant 0 : index
    %c0_36 = arith.constant 0 : index
    %76 = vector.load %arg8[%c0_35, %c0_36] : memref<32x32xf32, #tpu.memory_space<vmem>>, vector<32x32xf32>
    %cst_37 = arith.constant dense<0.000000e+00> : vector<32x32xf32>
    %77 = tpu.matmul %75, %76, %cst_37 {dimension_numbers = #tpu.dot_dimension_numbers<[1], [0], [0], [1], [0, 0, 1, 1], [], []>} : vector<32x32xf32>, vector<32x32xf32>, vector<32x32xf32> -> vector<32x32xf32>
    %cst_38 = arith.constant dense<0.000000e+00> : vector<32x32xf32>
    %78 = tpu.matmul %13, %77, %cst_38 {dimension_numbers = #tpu.dot_dimension_numbers<[1], [0], [0], [1], [0, 0, 1, 1], [], []>} : vector<32x32xf32>, vector<32x32xf32>, vector<32x32xf32> -> vector<32x32xf32>
    %cst_39 = arith.constant 0.000000e+00 : f32
    %79 = vector.broadcast %cst_39 : f32 to vector<32x32xf32>
    %80 = arith.maximumf %78, %79 : vector<32x32xf32>
    %81 = tpu.transpose %80, [1, 0] : vector<32x32xf32> -> vector<32x32xf32>
    %82 = arith.addf %80, %81 : vector<32x32xf32>
    %cst_40 = arith.constant 5.000000e-01 : f32
    %83 = vector.broadcast %cst_40 : f32 to vector<32x32xf32>
    %84 = arith.mulf %82, %83 : vector<32x32xf32>
    %cst_41 = arith.constant 1.000000e+00 : f32
    %85 = vector.broadcast %cst_41 : f32 to vector<32x32xf32>
    %86 = arith.select %2, %85, %84 : vector<32x32xi1>, vector<32x32xf32>
    %87 = math.absf %86 : vector<32x32xf32>
    %c0_42 = arith.constant 0 : index
    %c0_43 = arith.constant 0 : index
    %88 = vector.load %arg10[%c0_42, %c0_43] : memref<32x32xf32, #tpu.memory_space<vmem>>, vector<32x32xf32>
    tpu.vector_store %arg10[%c0_42, %c0_43], %87 {strides = array<i32>} : memref<32x32xf32, #tpu.memory_space<vmem>>, vector<32x32xf32>,
    return
  }
}

</mosaic_0001>

<bundles_post_ra>
// kernel: eagsrnet_forward.4
= control target key start
LH: loop header
LB: loop body
LE: loop exit
PB: predicated region body
PF: predicated region fallthrough
CT: control target
= control target key end

     0   :  { %13 = vsyncpa [#allocation3], 0  ;;  %s442_s0 = inlined_call_operand.vmem [shape: f32[16,16], index: 0, kind: input, shape index: {}]   ;;  %s443_s1 = inlined_call_operand.hbm [shape: f32[16,32], index: 1, kind: input, shape index: {}]   ;;  %s444_s2 = inlined_call_operand.vmem [shape: f32[1,32], index: 2, kind: input, shape index: {}]   ;;  %s445_s3 = inlined_call_operand.hbm [shape: f32[32,32], index: 3, kind: input, shape index: {}]   ;;  %s446_s4 = inlined_call_operand.vmem [shape: f32[1,32], index: 4, kind: input, shape index: {}]   ;;  %s447_s5 = inlined_call_operand.vmem [shape: f32[16,16], index: 5, kind: output, shape index: {0}]   ;;  %s448_s6 = inlined_call_operand.vmem [shape: f32[16,32], index: 6, kind: output, shape index: {1}]   ;;  %s449_s7 = inlined_call_operand.vmem [shape: f32[16,32], index: 7, kind: output, shape index: {2}]  }
   0x1   :  { %s21_s26 = sshll.u32 %s443_s1, 4  ;;  %s22_s26 = int_to_ptr.hbm [resolvable:$true] %s21_s26 }
   0x2   :  { %14 = vsyncpa [#allocation5], 0  ;;  %s348_s27 = smov [#allocation2]   ;;  %s36_s8 = sshll.u32 %s445_s3, 4  ;;  %s37_s8 = int_to_ptr.hbm [resolvable:$true] %s36_s8 }
   0x3   :  { %s23_s28 = sshll.u32 %s348_s27, 4  ;;  %s349_s9 = smov 128   ;;  %s24_s28 = int_to_ptr.vmem [resolvable:$true] %s23_s28 }
   0x4   :  { %s350_s10 = smov 8   ;;  %s351_s11 = smov [#allocation4]  }
   0x5   :  { %29 = dma.hbm_to_vmem [thread:$0]  %s22_s26, 256, %s24_s28, [#allocation3], %s349_s9, %s349_s9, %s350_s10  }
   0x6   :  { %s38_s12 = sshll.u32 %s351_s11, 4  ;;  %s39_s12 = int_to_ptr.vmem [resolvable:$true] %s38_s12 }
   0x7   :  { %44 = dma.hbm_to_vmem [thread:$0]  %s37_s8, 512, %s39_s12, [#allocation5], %s349_s9, %s349_s9, %s350_s10  }
   0x8   :  { %344 = dma.done.wait [#allocation3], 256  }
   0x9   :  { %345 = vsyncadd [#allocation3], 4294967040 }
   0xa   :  { %346 = dma.done.wait [#allocation5], 512  }
   0xb   :  { %347 = vsyncadd [#allocation5], 4294966784  ;;  %vm57_vm0 = vcmask 130048   ;;  %v55_v0 = vld [vmem:[%s442_s0] sm:$0xff]  ;;  %v56_v2 = vld [vmem:[%s442_s0 + $0x8] sm:$0xff]  ;;  %vm196_vm9 = vcmask 261120  }
   0xc   :  { %90 = vxpose.xlu1.b32.start [1/2] (short) (narrow) %v55_v0, 16  ;;  %v58_v1 = vsel %vm57_vm0, %v55_v0, 0.0  ;;  %v61_v3 = vsel %vm57_vm0, %v56_v2, 0.0  ;;  %v162_v24 = vld [vmem:[#allocation2 + $0x8] sm:$0xff]  ;;  %v161_v25 = vld [vmem:[#allocation2] sm:$0xff]  ;;  %v223_v36 = vld [vmem:[#allocation4 + $0x8] sm:$0xff] }
   0xd   :  { %59 = vadd.xlane.f32.xlu0 %v58_v1  ;;  %187 = vmatpush.msra.mxu0 %v162_v24  ;;  %v225_v34 = vld [vmem:[#allocation4 + $0x18] sm:$0xff]  ;;  %v224_v35 = vld [vmem:[#allocation4 + $0x10] sm:$0xff]  ;;  %v222_v42 = vld [vmem:[#allocation4] sm:$0xff] }
   0xe   :  { %248 = vmatpush.msra.mxu2 %v225_v34  ;;  %281 = vmatpush.msra.mxu3 %v225_v34  ;;  %v290_v37 = vld [vmem:[%s444_s2] ss:$0 sm:$0xff] }
   0xf   :  { %188 = vmatpush.msra.mxu0 %v161_v25  ;;  %v291_v45 = vld [vmem:[%s446_s4] ss:$0 sm:$0xff] }
  0x10   :  { %249 = vmatpush.msra.mxu2 %v224_v35  ;;  %282 = vmatpush.msra.mxu3 %v224_v35 }
  0x12   :  { %250 = vmatpush.msra.mxu2 %v223_v36  ;;  %283 = vmatpush.msra.mxu3 %v223_v36 }
  0x14   :  { %91 = vxpose.xlu1.b32.end [2/2] (short) (narrow) %v56_v2, 16  ;;  %251 = vmatpush.msra.mxu2 %v222_v42 }
  0x15   :  { %62 = vadd.xlane.f32.xlu0 %v61_v3  ;;  %284 = vmatpush.msra.mxu3 %v222_v42 }
  0x80   :  { %v60_v4 = vpop.xlane.xlu0 %59 }
  0x81   :  { %292 = vrsqrt.f32 %v60_v4  ;;  %vm70_vm2 = vweird.f32 %v60_v4 }
  0x87   :  { %v293_v5 = vpop.eup %292 }
  0x88   :  { %v65_v6 = vmul.f32 %v293_v5, %v60_v4  ;;  %v63_v7 = vpop.xlane.xlu0 %62  ;;  %vm71_vm1 = vweird.f32 %v293_v5 }
  0x89   :  { %294 = vrsqrt.f32 %v63_v7  ;;  %vm72_vm3 = vmor %vm70_vm2, %vm71_vm1  ;;  %vm80_vm6 = vweird.f32 %v63_v7 }
  0x8a   :  { %v66_v8 = vmul.f32 %v293_v5, %v65_v6 }
  0x8c   :  { %v67_v9 = vmul.f32 0.5, %v66_v8 }
  0x8e   :  { %v68_v10 = vsub.f32 1.5, %v67_v9 }
  0x8f   :  { %v295_v11 = vpop.eup %294 }
  0x90   :  { %v75_v12 = vmul.f32 %v295_v11, %v63_v7  ;;  %v69_v13 = vmul.f32 %v293_v5, %v68_v10  ;;  %vm81_vm5 = vweird.f32 %v295_v11 }
  0x91   :  { %vm82_vm7 = vmor %vm80_vm6, %vm81_vm5 }
  0x92   :  { %v76_v14 = vmul.f32 %v295_v11, %v75_v12  ;;  %v73_v15 = vsel %vm72_vm3, %v293_v5, %v69_v13 }
  0x93   :  { %v84_v16 = vand.u32 2147483647, %v73_v15 }
  0x94   :  { %v77_v17 = vmul.f32 0.5, %v76_v14 }
  0x95   :  { %vm86_vm4 = vcmp.eq.f32.partialorder %v84_v16, inf }
  0x96   :  { %v78_v18 = vsub.f32 1.5, %v77_v17  ;;  %v88_v19 = vsel %vm86_vm4, 0.0, %v73_v15 }
  0x97   :  { %124 = vxpose.xlu2.b32.start [1/2] (short) (narrow) %v88_v19, 8 }
  0x98   :  { %v79_v20 = vmul.f32 %v295_v11, %v78_v18 }
  0x9a   :  { %v83_v21 = vsel %vm82_vm7, %v295_v11, %v79_v20 }
  0x9b   :  { %v85_v22 = vand.u32 2147483647, %v83_v21 }
  0x9d   :  { %vm87_vm8 = vcmp.eq.f32.partialorder %v85_v22, inf }
  0x9e   :  { %v89_v23 = vsel %vm87_vm8, 0.0, %v83_v21 }
  0x9f   :  { %125 = vxpose.xlu2.b32.end [2/2] (short) (narrow) %v89_v23, 8 }
  0xb0   :  { %v106_v26 = vpop.trf.xlu1 }
  0xb1   :  { %v122_v29 = vmul.f32 %v106_v26, %v88_v19 }
  0xb8   :  { %v107_v27 = vpop.trf.xlu1 }
  0xb9   :  { %v123_v30 = vmul.f32 %v107_v27, %v89_v23 }
 0x130   :  { %v140_v28 = vpop.trf.xlu2 }
 0x131   :  { %v156_v31 = vperm.slane %v140_v28, 0 }
 0x133   :  { %v157_v32 = vmul.f32 %v156_v31, %v122_v29  ;;  %v158_v33 = vmul.f32 %v156_v31, %v123_v30 }
 0x135   :  { %159 = vst.msk [vmem:[%s447_s5] sm:$0xff] %vm57_vm0, %v157_v32  ;;  %275 = vmatmul.msk.f32.vlgmr.msra.gmra.mxu0 %vm57_vm0, %v157_v32 }
 0x136   :  { %160 = vst.msk [vmem:[%s447_s5 + $0x8] sm:$0xff] %vm57_vm0, %v158_v33 }
 0x13d   :  { %276 = vmatmul.msk.f32.gmra.mxu0 %vm57_vm0, %v158_v33 }
 0x1b2   :  { %v190_v38 = vpop.f32.mrf.mxu0 }
 0x1b3   :  { %v191_v39 = vadd.f32 %v290_v37, %v190_v38 }
 0x1b5   :  { %197 = vst.msk [vmem:[%s448_s6] sm:$0xff] %vm196_vm9, %v191_v39 }
 0x1ba   :  { %v193_v40 = vpop.f32.mrf.mxu0 }
 0x1bb   :  { %v194_v41 = vadd.f32 %v290_v37, %v193_v40 }
 0x1bd   :  { %198 = vst.msk [vmem:[%s448_s6 + $0x8] sm:$0xff] %vm196_vm9, %v194_v41  ;;  %213 = vmatpush.msra.mxu1 %v194_v41 }
 0x1bf   :  { %214 = vmatpush.msra.mxu1 %v191_v39 }
 0x1c0   :  { %277 = vmatmul.msk.f32.vlgmr.msra.gmra.mxu1 %vm57_vm0, %v157_v32 }
 0x1c8   :  { %278 = vmatmul.msk.f32.gmra.mxu1 %vm57_vm0, %v158_v33 }
 0x23d   :  { %v216_v43 = vpop.f32.mrf.mxu1 }
 0x23e   :  { %279 = vmatmul.msk.f32.vlgmr.msra.gmra.mxu2 %vm196_vm9, %v216_v43 }
 0x245   :  { %v219_v44 = vpop.f32.mrf.mxu1 }
 0x246   :  { %280 = vmatmul.msk.f32.vlgmr.msra.gmra.mxu3 %vm196_vm9, %v219_v44 }
 0x2c1   :  { %v253_v46 = vpop.f32.mrf.mxu2 }
 0x2c2   :  { %v254_v47 = vadd.f32 %v291_v45, %v253_v46 }
 0x2c4   :  { %259 = vst.msk [vmem:[%s449_s7] sm:$0xff] %vm196_vm9, %v254_v47 }
 0x2c9   :  { %v256_v48 = vpop.f32.mrf.mxu3 }
 0x2ca   :  { %v257_v49 = vadd.f32 %v291_v45, %v256_v48 }
 0x2cc   :  { %260 = vst.msk [vmem:[%s449_s7 + $0x8] sm:$0xff] %vm196_vm9, %v257_v49 }
 0x2cd   :  { %273 = vsyncpa [#allocation3], 1 }
 0x2ce   :  { %274 = vsyncpa [#allocation5], 1 }

// kernel: eagsrnet_forward.5
= control target key start
LH: loop header
LB: loop body
LE: loop exit
PB: predicated region body
PF: predicated region fallthrough
CT: control target
= control target key end

     0   :  { %v231_v2 = vmov 0   ;;  %vm29_vm0 = vcmask 130048   ;;  %vm137_vm1 = vcmask 1043456   ;;  %vm88_vm2 = vcmask 97280   ;;  %s331_s0 = inlined_call_operand.vmem [shape: f32[16,16], index: 0, kind: input, shape index: {}]   ;;  %s332_s2 = inlined_call_operand.vmem [shape: f32[12,16], index: 2, kind: input, shape index: {}]   ;;  %s333_s1 = inlined_call_operand.vmem [shape: f32[16,32], index: 1, kind: input, shape index: {}]   ;;  %s334_s3 = inlined_call_operand.vmem [shape: f32[12,1], index: 3, kind: input, shape index: {}]   ;;  %s335_s4 = inlined_call_operand.vmem [shape: f32[32,32], index: 4, kind: input, shape index: {}]   ;;  %s336_s6 = inlined_call_operand.vmem [shape: f32[12,12], index: 6, kind: output, shape index: {0}]   ;;  %s337_s5 = inlined_call_operand.vmem [shape: f32[1,32], index: 5, kind: input, shape index: {}]   ;;  %s338_s7 = inlined_call_operand.vmem [shape: f32[12,32], index: 7, kind: output, shape index: {1}]  }
   0x1   :  { %v28_v0 = vld [vmem:[%s331_s0 + $0x8] sm:$0xff]  ;;  %v27_v1 = vld [vmem:[%s331_s0] sm:$0xff]  ;;  %229 = vset.pattern.permute.xlu0 %v231_v2  ;;  %v167_v17 = vld [vmem:[%s335_s4 + $0x18] sm:$0xff]  ;;  %vm90_vm3 = vcmask 93184   ;;  %vm172_vm4 = vcmask 261120   ;;  %vm203_vm5 = vcmask 257024  }
   0x2   :  { %50 = vmatpush.msra.mxu0 %v28_v0  ;;  %226 = vmatpush.msra.mxu2 %v28_v0  ;;  %v25_v3 = vld [vmem:[%s332_s2] sm:$0xff]  ;;  %v26_v4 = vld [vmem:[%s332_s2 + $0x8] sm:$0xf]  ;;  %v166_v18 = vld [vmem:[%s335_s4 + $0x10] sm:$0xff] }
   0x3   :  { %v93_v5 = vld [vmem:[%s333_s1 + $0x8] sm:$0xff]  ;;  %215 = vmatpush.xpose.msk.msra.mxu1 %vm29_vm0, %v26_v4  ;;  %v92_v7 = vld [vmem:[%s333_s1] sm:$0xff] }
   0x4   :  { %v118_v6 = vld [vmem:[%s334_s3 + $0x8] sm:$0xf]  ;;  %51 = vmatpush.msra.mxu0 %v27_v1  ;;  %227 = vmatpush.msra.mxu2 %v27_v1  ;;  %v117_v8 = vld [vmem:[%s334_s3] sm:$0xff] }
   0x5   :  { %213 = vmatmul.msk.f32.vlgmr.msra.gmra.mxu0 %vm29_vm0, %v25_v3  ;;  %214 = vmatmul.msk.f32.vlgmr.msra.gmra.mxu2 %vm29_vm0, %v26_v4  ;;  %v165_v19 = vld [vmem:[%s335_s4 + $0x8] sm:$0xff]  ;;  %v164_v20 = vld [vmem:[%s335_s4] sm:$0xff] }
   0x6   :  { %108 = vmatpush.msrb.mxu2 %v93_v5  ;;  %126 = vperm.xlu0 %229, %v118_v6   ;;  %v230_v25 = vld [vmem:[%s337_s5] ss:$0 sm:$0xff] }
   0x7   :  { %216 = vmatpush.xpose.msk.msra.mxu1 %vm29_vm0, %v25_v3  ;;  %191 = vmatpush.msrb.mxu0 %v167_v17 }
   0x8   :  { %109 = vmatpush.msrb.mxu2 %v92_v7 }
   0x9   :  { %192 = vmatpush.msrb.mxu0 %v166_v18 }
   0xb   :  { %193 = vmatpush.msrb.mxu0 %v165_v19 }
   0xd   :  { %219 = vmatmul.msk.f32.vlgmr.msrb.gmra.mxu2 %vm29_vm0, %v25_v3  ;;  %194 = vmatpush.msrb.mxu0 %v164_v20 }
   0xe   :  { %121 = vperm.xlu0 %229, %v117_v8  }
  0x15   :  { %220 = vmatmul.msk.f32.gmra.mxu2 %vm29_vm0, %v26_v4 }
  0x78   :  { %v127_v11 = vpop.permute.xlu0 %126 }
  0x80   :  { %v122_v13 = vpop.permute.xlu0 %121 }
  0x82   :  { %v53_v9 = vpop.f32.mrf.mxu0 }
  0x83   :  { %217 = vmatmul.msk.f32.vlgmr.msra.gmra.mxu1 %vm29_vm0, %v53_v9 }
  0x88   :  { %v56_v10 = vpop.f32.mrf.mxu2 }
  0x8b   :  { %218 = vmatmul.msk.f32.gmra.mxu1 %vm29_vm0, %v56_v10 }
  0x90   :  { %v111_v12 = vpop.f32.mrf.mxu2 }
  0x91   :  { %v129_v16 = vmul.f32 %v122_v13, %v111_v12 }
  0x98   :  { %v114_v14 = vpop.f32.mrf.mxu2 }
  0x99   :  { %v130_v15 = vmul.f32 %v127_v11, %v114_v14 }
  0x9b   :  { %221 = vmatpush.msk.msra.mxu3 %vm137_vm1, %v130_v15 }
  0x9d   :  { %156 = vmatpush.msra.mxu3 %v129_v16 }
 0x100   :  { %v82_v21 = vpop.f32.mrf.mxu1 }
 0x101   :  { %89 = vst.msk [vmem:[%s336_s6] sm:$0xff] %vm88_vm2, %v82_v21  ;;  %222 = vmatmul.msk.f32.vlgmr.msra.gmra.mxu3 %vm88_vm2, %v82_v21 }
 0x108   :  { %v85_v22 = vpop.f32.mrf.mxu1 }
 0x109   :  { %91 = vst.msk [vmem:[%s336_s6 + $0x8] sm:$0xf] %vm90_vm3, %v85_v22  ;;  %223 = vmatmul.msk.f32.gmra.mxu3 %vm88_vm2, %v85_v22 }
 0x184   :  { %v158_v23 = vpop.f32.mrf.mxu3 }
 0x185   :  { %224 = vmatmul.msk.f32.vlgmr.msrb.gmra.mxu0 %vm172_vm4, %v158_v23 }
 0x18c   :  { %v161_v24 = vpop.f32.mrf.mxu3 }
 0x18d   :  { %225 = vmatmul.msk.f32.gmra.mxu0 %vm172_vm4, %v161_v24 }
 0x202   :  { %v196_v26 = vpop.f32.mrf.mxu0 }
 0x203   :  { %v197_v27 = vadd.f32 %v230_v25, %v196_v26 }
 0x205   :  { %202 = vst.msk [vmem:[%s338_s7] sm:$0xff] %vm172_vm4, %v197_v27 }
 0x20a   :  { %v199_v28 = vpop.f32.mrf.mxu0 }
 0x20b   :  { %v200_v29 = vadd.f32 %v230_v25, %v199_v28 }
 0x20d   :  { %204 = vst.msk [vmem:[%s338_s7 + $0x8] sm:$0xf] %vm203_vm5, %v200_v29 }

// kernel: custom-call.2
= control target key start
LH: loop header
LB: loop body
LE: loop exit
PB: predicated region body
PF: predicated region fallthrough
CT: control target
= control target key end

     0   :  { %s2361_s30 = smov [#allocation0]   ;;  %s2721_s0 = inlined_call_operand.vmem [shape: f32[8,8], index: 0, kind: input, shape index: {}]   ;;  %s2722_s1 = inlined_call_operand.vmem [shape: f32[8,8], index: 1, kind: input, shape index: {}]   ;;  %s2723_s2 = inlined_call_operand.vmem [shape: f32[8,8], index: 2, kind: input, shape index: {}]   ;;  %s2724_s3 = inlined_call_operand.vmem [shape: f32[8,8], index: 3, kind: input, shape index: {}]   ;;  %s2725_s4 = inlined_call_operand.vmem [shape: f32[8], index: 4, kind: output, shape index: {0}]   ;;  %s2726_s5 = inlined_call_operand.vmem [shape: f32[8], index: 5, kind: output, shape index: {1}]   ;;  %s2727_s6 = inlined_call_operand.vmem [shape: f32[8,8], index: 6, kind: output, shape index: {2}]   ;;  %s2728_s7 = inlined_call_operand.vmem [shape: f32[8,8], index: 7, kind: output, shape index: {3}]   ;;  %s2729_s8 = inlined_call_operand.vmem [shape: f32[8,8], index: 8, kind: output, shape index: {4}]   ;;  %s2730_s9 = inlined_call_operand.vmem [shape: f32[8,8], index: 9, kind: output, shape index: {5}]  }
   0x1   :  { %s2365_s12 = smov %s2721_s0  }
   0x2 LB: > { %v54_v0 = vld [vmem:[%s2367_s12] sm:$0xff]  ;;  %s56_s12 = scalar_lea.vmem %s2367_s12, 8   ;;  %s2367_s12 = sphi %s2365_s12, %s56_s12   ;;  %s2363_s30 = sphi %s2361_s30, %s57_s30  }
   0x3   : > { %55 = vst [vmem:[%s2363_s30] sm:$0xff] %v54_v0  ;;  %s57_s30 = scalar_lea.vmem %s2363_s30, 8   ;;  %p51_p0 = scmp.gt.s32.totalorder %s56_s12, %s2721_s0 }
   0x4   :  { %s2369_s15 = smov (%p51_p0), [#allocation1]   ;;  %s2373_s18 = smov (%p51_p0), %s2722_s1  }
   0x5   :  { %53 = sbr.rel (!%p51_p0) target bundleno = 2 (0x2), region = 358 }
   0xa LB: > { %v110_v1 = vld [vmem:[%s2375_s18] sm:$0xff]  ;;  %s112_s18 = scalar_lea.vmem %s2375_s18, 8   ;;  %s2375_s18 = sphi %s2373_s18, %s112_s18   ;;  %s2371_s15 = sphi %s2369_s15, %s113_s15  }
   0xb   : > { %111 = vst [vmem:[%s2371_s15] sm:$0xff] %v110_v1  ;;  %s113_s15 = scalar_lea.vmem %s2371_s15, 8   ;;  %p107_p1 = scmp.gt.s32.totalorder %s112_s18, %s2722_s1 }
   0xc   :  { %s2377_s0 = smov (%p107_p1), [#allocation2]   ;;  %s2381_s23 = smov (%p107_p1), %s2723_s2  }
   0xd   :  { %109 = sbr.rel (!%p107_p1) target bundleno = 10 (0xa), region = 380 }
  0x12 LB: > { %v166_v2 = vld [vmem:[%s2383_s23] sm:$0xff]  ;;  %s168_s23 = scalar_lea.vmem %s2383_s23, 8   ;;  %s2383_s23 = sphi %s2381_s23, %s168_s23   ;;  %s2379_s0 = sphi %s2377_s0, %s169_s0  }
  0x13   : > { %167 = vst [vmem:[%s2379_s0] sm:$0xff] %v166_v2  ;;  %s169_s0 = scalar_lea.vmem %s2379_s0, 8   ;;  %p163_p2 = scmp.gt.s32.totalorder %s168_s23, %s2723_s2 }
  0x14   :  { %s2385_s1 = smov (%p163_p2), [#allocation3]   ;;  %s2389_s28 = smov (%p163_p2), %s2724_s3  }
  0x15   :  { %165 = sbr.rel (!%p163_p2) target bundleno = 18 (0x12), region = 402 }
  0x1a LB: > { %v222_v3 = vld [vmem:[%s2391_s28] sm:$0xff]  ;;  %s224_s28 = scalar_lea.vmem %s2391_s28, 8   ;;  %s2391_s28 = sphi %s2389_s28, %s224_s28   ;;  %s2387_s1 = sphi %s2385_s1, %s225_s1  }
  0x1b   : > { %223 = vst [vmem:[%s2387_s1] sm:$0xff] %v222_v3  ;;  %s225_s1 = scalar_lea.vmem %s2387_s1, 8   ;;  %p219_p3 = scmp.gt.s32.totalorder %s224_s28, %s2724_s3 }
  0x1c   :  { %s235_s2 = smov (%p219_p3), [#allocation12]  ;;  %v236_v4 = vld [vmem:[#allocation0] sm:$0xff] (%p219_p3)  ;;  %s238_s10 = smov (%p219_p3), [#allocation13]  ;;  %v239_v5 = vld [vmem:[#allocation1] sm:$0xff] (%p219_p3)  ;;  %v242_v6 = vld [vmem:[#allocation2] sm:$0xff] (%p219_p3)  ;;  %v252_v7 = vlaneseq (%p219_p3)  ;;  %v2433_v11 = vmov (%p219_p3), 0.0  }
  0x1d   :  { %221 = sbr.rel (!%p219_p3) target bundleno = 26 (0x1a), region = 424  ;;  %237 = vst [vmem:[%s235_s2] sm:$0xff] (%p219_p3), %v236_v4  ;;  %s241_s11 = smov (%p219_p3), [#allocation14] }
  0x1e   :  { %s244_s12 = smov (%p219_p3), [#allocation15]  ;;  %240 = vst [vmem:[%s238_s10] sm:$0xff] (%p219_p3), %v239_v5  ;;  %v2510_v9 = vand.u32 (%p219_p3), 127, %v252_v7  ;;  %v2512_v10 = vshrl.u32 (%p219_p3), %v252_v7, 7  ;;  %s251_s3 = smov (%p219_p3), [#allocation8] }
  0x1f   :  { %243 = vst [vmem:[%s241_s11] sm:$0xff] (%p219_p3), %v242_v6  ;;  %s264_s13 = smov (%p219_p3), [#allocation11]  ;;  %s1387_s14 = smov (%p219_p3), [#allocation12] }
  0x20   :  { %247 = vst [vmem:[#allocation8] sm:$0xff] (%p219_p3), %v2433_v11  ;;  %v254_v9 = vmov (%p219_p3), %v2510_v9  ;;  %v257_v10 = vmov (%p219_p3), %v2512_v10  ;;  %vm1391_vm2 = vcmp.lt.s32.totalorder (%p219_p3), %v2510_v9, 8  ;;  %s1404_s15 = smov (%p219_p3), [#allocation13]  ;;  %s1421_s16 = smov (%p219_p3), [#allocation14] }
  0x21   :  { %248 = vst [vmem:[#allocation9] sm:$0xff] (%p219_p3), %v2433_v11  ;;  %vm261_vm0 = vcmp.eq.s32.totalorder (%p219_p3), %v257_v10, %v254_v9  ;;  %v267_v9 = vmov (%p219_p3), %v2510_v9  ;;  %v270_v10 = vmov (%p219_p3), %v2512_v10  ;;  %s1438_s17 = smov (%p219_p3), [#allocation15] }
  0x22   :  { %v245_v8 = vld [vmem:[#allocation3] sm:$0xff]  ;;  %249 = vst [vmem:[#allocation10] sm:$0xff] %v2433_v11  ;;  %vm274_vm1 = vcmp.eq.s32.totalorder %v270_v10, %v267_v9  ;;  %v1383_v9 = vmov %v2510_v9  ;;  %v1386_v10 = vmov %v2512_v10 }
  0x23   :  { %246 = vst [vmem:[%s244_s12] sm:$0xff] %v245_v8  ;;  %v1400_v9 = vmov %v2510_v9  ;;  %v1403_v10 = vmov %v2512_v10  ;;  %vm1396_vm3 = vcmp.eq.s32.totalorder %v1386_v10, %v1383_v9 }
  0x24   :  { %250 = vst [vmem:[#allocation11] sm:$0xff] %v2433_v11  ;;  %v1393_v16 = vld [vmem:[%s1387_s14] sm:$0xff]  ;;  %v1417_v9 = vmov %v2510_v9  ;;  %v1420_v10 = vmov %v2512_v10 }
  0x25   :  { %v1410_v17 = vld [vmem:[%s1404_s15] sm:$0xff]  ;;  %v1394_v18 = vsel %vm1391_vm2, %v1393_v16, 0.0  ;;  %v1434_v9 = vmov %v2510_v9  ;;  %v1437_v10 = vmov %v2512_v10 }
  0x26   :  { %v1411_v19 = vsel %vm1391_vm2, %v1410_v17, 0.0  ;;  %v1427_v20 = vld [vmem:[%s1421_s16] sm:$0xff]  ;;  %v1395_v22 = vmul.f32 %v1394_v18, %v1394_v18  ;;  %vm1447_vm4 = vcmp.eq.s32.totalorder %v1437_v10, %v1434_v9 }
  0x27   :  { %v258_v12 = vld [vmem:[%s251_s3] sm:$0xff]  ;;  %v1412_v23 = vmul.f32 %v1411_v19, %v1411_v19  ;;  %v1428_v24 = vsel %vm1391_vm2, %v1427_v20, 0.0 }
  0x28   :  { %v262_v13 = vsel %vm261_vm0, 1.0, %v258_v12  ;;  %v1429_v26 = vmul.f32 %v1428_v24, %v1428_v24  ;;  %v1397_v29 = vsel %vm1396_vm3, 0.0, %v1395_v22 }
  0x29   :  { %263 = vst [vmem:[%s251_s3] sm:$0xff] %v262_v13  ;;  %v1414_v27 = vadd.f32 %v1412_v23, %v1395_v22  ;;  %v1413_v31 = vadd.f32 %v1412_v23, %v1397_v29 }
  0x2a   :  { %v1444_v21 = vld [vmem:[%s1438_s17] sm:$0xff] }
  0x2b   :  { %v271_v14 = vld [vmem:[%s264_s13] sm:$0xff]  ;;  %v1445_v25 = vsel %vm1391_vm2, %v1444_v21, 0.0  ;;  %v1431_v30 = vadd.f32 %v1429_v26, %v1414_v27  ;;  %v1430_v33 = vadd.f32 %v1429_v26, %v1413_v31 }
  0x2c   :  { %v275_v15 = vsel %vm274_vm1, 1.0, %v271_v14  ;;  %v1446_v28 = vmul.f32 %v1445_v25, %v1445_v25 }
  0x2d   :  { %276 = vst [vmem:[%s264_s13] sm:$0xff] %v275_v15 }
  0x2e   :  { %v1450_v32 = vadd.f32 %v1446_v28, %v1431_v30  ;;  %v1448_v34 = vsel %vm1447_vm4, 0.0, %v1446_v28 }
  0x2f   :  { %v1449_v35 = vadd.f32 %v1448_v34, %v1430_v33 }
  0x30   :  { %1451 = vadd.xlane.f32.xlu0 %v1450_v32 }
  0x38   :  { %1459 = vadd.xlane.f32.xlu0 %v1449_v35 }
  0xa3   :  { %v1452_v36 = vpop.xlane.xlu0 %1451 }
  0xa4   :  { %v1453_v37 = vrot.slane %v1452_v36, 4 }
  0xa6   :  { %v1454_v38 = vadd.f32 %v1453_v37, %v1452_v36 }
  0xa8   :  { %v1455_v39 = vrot.slane %v1454_v38, 2 }
  0xaa   :  { %v1456_v43 = vadd.f32 %v1455_v39, %v1454_v38 }
  0xab   :  { %v1460_v40 = vpop.xlane.xlu0 %1459 }
  0xac   :  { %v1461_v41 = vrot.slane %v1460_v40, 4  ;;  %v1457_v46 = vrot.slane %v1456_v43, 1 }
  0xae   :  { %v1462_v42 = vadd.f32 %v1461_v41, %v1460_v40  ;;  %v1458_v49 = vadd.f32 %v1457_v46, %v1456_v43 }
  0xb0   :  { %v1463_v44 = vrot.slane %v1462_v42, 2 }
  0xb2   :  { %v1464_v45 = vadd.f32 %v1463_v44, %v1462_v42 }
  0xb4   :  { %v1465_v47 = vrot.slane %v1464_v45, 1 }
  0xb6   :  { %v1466_v48 = vadd.f32 %v1465_v47, %v1464_v45 }
  0xb8   :  { %1642 = vpush %v1466_v48 }
  0xb9   :  { %1644 = vpush %v1458_v49 }
  0xe9   :  { %s1643_s18 = spop %1642 }
  0xea   :  { %s1645_s19 = spop %1644 }
  0xeb   :  { %s1469_s20 = smul.f32 1e-10, %s1645_s19 }
  0xed   :  { %p1470_p4 = scmp.le.f32.partialorder %s1643_s18, %s1469_s20 }
  0xee   :  { %s2535_s0 = smov (!%p1470_p4), 0  }
  0xef   :  { %1473 = sbr.rel (%p1470_p4) target bundleno = 897 (0x381), region = 440 }
  0xf4 LB: > { %s2540_s21 = smov 0   ;;  %s2395_s0 = sphi %s2535_s0, %s2731_s0  }
  0xf5 LB: >> { %s381_s22 = smov [#allocation12]  ;;  %v385_v9 = vmov %v2510_v9  ;;  %v388_v10 = vmov %v2512_v10  ;;  %s401_s23 = smov [#allocation13]  ;;  %s2399_s21 = sphi %s2540_s21, %s380_s21  }
  0xf6   : >> { %v405_v9 = vmov %v2510_v9  ;;  %v408_v10 = vmov %v2512_v10  ;;  %v389_v50 = vld [vmem:[%s381_s22] sm:$0xff]  ;;  %vm392_vm5 = vcmp.eq.s32.totalorder %v388_v10, %v385_v9  ;;  %s421_s24 = smov [#allocation15]  ;;  %s382_s25 = smov [#allocation16] }
  0xf7   : >> { %vm412_vm6 = vcmp.eq.s32.totalorder %v408_v10, %v405_v9  ;;  %v425_v9 = vmov %v2510_v9  ;;  %v428_v10 = vmov %v2512_v10  ;;  %v393_v51 = vsel %vm392_vm5, %v389_v50, 0.0  ;;  %v409_v52 = vld [vmem:[%s401_s23] sm:$0xff]  ;;  %s402_s1 = smov [#allocation17]  ;;  %s422_s26 = smov [#allocation18] }
  0xf8   : >> { %vm432_vm7 = vcmp.eq.s32.totalorder %v428_v10, %v425_v9  ;;  %v394_v53 = vrot.slane %v393_v51, 4  ;;  %v413_v54 = vsel %vm412_vm6, %v409_v52, 0.0  ;;  %v429_v55 = vld [vmem:[%s421_s24] sm:$0xff]  ;;  %s445_s27 = smov [#allocation17]  ;;  %s443_s28 = smov [#allocation16]  ;;  %v534_v9 = vmov %v2510_v9 }
  0xf9   : >> { %v414_v56 = vrot.slane %v413_v54, 4  ;;  %v433_v57 = vsel %vm432_vm7, %v429_v55, 0.0  ;;  %s447_s29 = smov [#allocation18]  ;;  %s522_s30 = smov [#allocation19]  ;;  %v537_v10 = vmov %v2512_v10 }
  0xfa   : >> { %v395_v58 = vadd.f32 %v394_v53, %v393_v51  ;;  %v434_v59 = vrot.slane %v433_v57, 4  ;;  %s524_s2 = smov [#allocation20]  ;;  %s441_s10 = smov [#allocation21] }
  0xfb   : >> { %v415_v60 = vadd.f32 %v414_v56, %v413_v54  ;;  %s442_s11 = smov [#allocation22]  ;;  %s526_s10 = smov %s441_s10 }
  0xfc   : >> { %v396_v61 = vrot.slane %v395_v58, 2  ;;  %v435_v62 = vadd.f32 %v434_v59, %v433_v57  ;;  %s528_s11 = smov %s442_s11  ;;  %s530_s12 = smov [#allocation21] }
  0xfd   : >> { %v416_v63 = vrot.slane %v415_v60, 2  ;;  %s545_s3 = smov [#allocation22]  ;;  %s543_s13 = smov [#allocation23] }
  0xfe   : >> { %v397_v0 = vadd.f32 %v396_v61, %v395_v58  ;;  %v436_v1 = vrot.slane %v435_v62, 2  ;;  %s558_s14 = smov [#allocation24]  ;;  %s560_s15 = smov [#allocation23] }
  0xff   : >> { %v417_v2 = vadd.f32 %v416_v63, %v415_v60  ;;  %s2560_s16 = smov [#allocation12]  ;;  %s2562_s17 = smov [#allocation13] }
 0x100   : >> { %v398_v3 = vrot.slane %v397_v0, 1  ;;  %v437_v4 = vadd.f32 %v436_v1, %v435_v62  ;;  %s2564_s18 = smov [#allocation14]  ;;  %s784_s19 = smov [#allocation23] }
 0x101   : >> { %v418_v5 = vrot.slane %v417_v2, 1  ;;  %s2566_s20 = smov [#allocation8]  ;;  %s2568_s22 = smov [#allocation9] }
 0x102   : >> { %v399_v6 = vadd.f32 %v398_v3, %v397_v0  ;;  %v438_v7 = vrot.slane %v437_v4, 1  ;;  %s2570_s23 = smov [#allocation15]  ;;  %s2572_s24 = smov [#allocation10] }
 0x103   : >> { %v419_v8 = vadd.f32 %v418_v5, %v417_v2  ;;  %s380_s21 = sadd.s32 1, %s2399_s21  }
 0x104   : >> { %400 = vst [vmem:[%s382_s25] sm:$0x1] %v399_v6  ;;  %v439_v11 = vadd.f32 %v438_v7, %v437_v4  ;;  %s562_s25 = smov [#allocation24]  ;;  %p377_p5 = scmp.ge.s32.totalorder %s380_s21, 15  }
 0x105   : >> { %420 = vst [vmem:[%s402_s1] sm:$0x1] %v419_v8  ;;  %s786_s1 = smov [#allocation24] }
 0x106   : >> { %440 = vst [vmem:[%s422_s26] sm:$0x1] %v439_v11  ;;  %s2576_s26 = smov [#allocation11] }
 0x10b   : >> { %v444_v19 = vld [vmem:[%s443_s28] sm:$0xff]  ;;  %s590_s28 = smov [#allocation22] }
 0x10c   : >> { %v2551_v12 = vld [vmem:[%s445_s27] sm:$0xff]  ;;  %v498_v43 = vand.u32 2147483647, %v444_v19  ;;  %s588_s27 = smov [#allocation21] }
 0x10d   : >> { %v450_v13 = vmul.f32 2.0, %v2551_v12  ;;  %v448_v20 = vld [vmem:[%s447_s29] sm:$0xff]  ;;  %v499_v51 = vand.u32 2147483647, %v2551_v12  ;;  %s2590_s29 = smov [#allocation14] }
 0x10e   : >> { %v449_v23 = vsub.f32 %v448_v20, %v444_v19  ;;  %v500_v44 = vand.u32 2147483647, %v448_v20 }
 0x10f   : >> { %2121 = vrcp.f32 %v450_v13  ;;  %v462_v16 = vand.u32 2147483648, %v450_v13  ;;  %vm456_vm8 = vweird.f32 %v450_v13  ;;  %v460_v18 = vand.u32 2147483647, %v450_v13 }
 0x110   : >> { %v501_v46 = vmin.f32 %v498_v43, %v500_v44 }
 0x111   : >> { %v463_v22 = vor.u32 1.1754944e-38, %v462_v16  ;;  %vm461_vm11 = vcmp.eq.f32.partialorder %v460_v18, 8.507059e+37  ;;  %v569_v16 = vld [vmem:[%s2562_s17] sm:$0xff] }
 0x112   : >> { %v502_v52 = vmul.f32 1.1920929e-08, %v501_v46 }
 0x114   : >> { %vm503_vm4 = vcmp.le.f32.partialorder %v499_v51, %v502_v52 }
 0x115   : >> { %v2122_v14 = vpop.eup %2121 }
 0x116   : >> { %v452_v15 = vmul.f32 %v2122_v14, %v450_v13  ;;  %vm457_vm9 = vweird.f32 %v2122_v14 }
 0x117   : >> { %vm458_vm10 = vmor %vm456_vm8, %vm457_vm9  ;;  %vm539_vm8 = vcmp.eq.s32.totalorder %v537_v10, %v534_v9  ;;  %v549_v9 = vmov %v2510_v9  ;;  %v552_v10 = vmov %v2512_v10 }
 0x118   : >> { %v453_v17 = vsub.f32 1.0, %v452_v15  ;;  %vm554_vm9 = vcmp.eq.s32.totalorder %v552_v10, %v549_v9  ;;  %v620_v9 = vmov %v2510_v9 }
 0x119   : >> { %v661_v9 = vmov %v2510_v9 }
 0x11a   : >> { %v454_v21 = vmul.f32 %v2122_v14, %v453_v17  ;;  %v570_v17 = vld [vmem:[%s2564_s18] sm:$0xff]  ;;  %v647_v9 = vmov %v2510_v9 }
 0x11c   : >> { %v455_v24 = vadd.f32 %v2122_v14, %v454_v21 }
 0x11e   : >> { %v459_v25 = vsel %vm458_vm10, %v2122_v14, %v455_v24  ;;  %v794_v24 = vld [vmem:[%s2572_s24] sm:$0xff]  ;;  %vm744_vm10 = vcmp.eq.s32.totalorder %v2512_v10, 0 }
 0x11f   : >> { %v464_v26 = vsel %vm461_vm11, %v463_v22, %v459_v25  ;;  %v568_v22 = vld [vmem:[%s2560_s16] sm:$0xff]  ;;  %vm756_vm11 = vcmp.eq.s32.totalorder %v2512_v10, 7  ;;  %v623_v10 = vmov %v2512_v10 }
 0x120   : >> { %v465_v27 = vmul.f32 %v464_v26, %v449_v23  ;;  %v571_v23 = vld [vmem:[%s2570_s23] sm:$0xff]  ;;  %v664_v10 = vmov %v2512_v10 }
 0x121   : >> { %v650_v10 = vmov %v2512_v10 }
 0x122   : >> { %v467_v28 = vmul.f32 %v465_v27, %v465_v27  ;;  %vm466_vm14 = vcmp.ge.f32.partialorder %v465_v27, 0.0 }
 0x124   : >> { %v468_v29 = vadd.f32 1.0, %v467_v28 }
 0x126   : >> { %2123 = vrsqrt.f32 %v468_v29  ;;  %vm476_vm12 = vcmp.eq.f32.partialorder %v468_v29, inf  ;;  %v479_v36 = vand.u32 2147483648, %v468_v29  ;;  %vm478_vm13 = vcmp.eq.f32.partialorder %v468_v29, 0.0 }
 0x12c   : >> { %v2124_v30 = vpop.eup %2123 }
 0x12d   : >> { %v470_v31 = vmul.f32 %v2124_v30, %v468_v29 }
 0x12f   : >> { %v471_v32 = vmul.f32 %v2124_v30, %v470_v31 }
 0x131   : >> { %v472_v33 = vmul.f32 0.5, %v471_v32 }
 0x133   : >> { %v473_v34 = vsub.f32 1.5, %v472_v33 }
 0x135   : >> { %v474_v35 = vmul.f32 %v2124_v30, %v473_v34 }
 0x137   : >> { %v475_v37 = vmul.f32 %v474_v35, %v468_v29 }
 0x139   : >> { %v477_v38 = vsel %vm476_vm12, %v468_v29, %v475_v37  ;;  %v795_v29 = vld [vmem:[%s2576_s26] sm:$0xff]  ;;  %vm628_vm12 = vcmp.eq.s32.totalorder %v623_v10, %v620_v9  ;;  %v634_v9 = vmov %v2510_v9  ;;  %v637_v10 = vmov %v2512_v10 }
 0x13a   : >> { %v480_v39 = vsel %vm478_vm13, %v479_v36, %v477_v38  ;;  %vm669_vm13 = vcmp.eq.s32.totalorder %v664_v10, %v661_v9 }
 0x13b   : >> { %v481_v40 = vxor.u32 2147483648, %v480_v39 }
 0x13d   : >> { %v482_v41 = vsel %vm466_vm14, %v480_v39, %v481_v40  ;;  %vm654_vm14 = vcmp.eq.s32.totalorder %v650_v10, %v647_v9 }
 0x13e   : >> { %v483_v42 = vadd.f32 %v482_v41, %v465_v27 }
 0x140   : >> { %2125 = vrcp.f32 %v483_v42  ;;  %v495_v48 = vand.u32 2147483648, %v483_v42  ;;  %vm489_vm15 = vweird.f32 %v483_v42  ;;  %v493_v50 = vand.u32 2147483647, %v483_v42 }
 0x142   : >> { %v496_v54 = vor.u32 1.1754944e-38, %v495_v48  ;;  %vm494_vm3 = vcmp.eq.f32.partialorder %v493_v50, 8.507059e+37 }
 0x146   : >> { %v2126_v45 = vpop.eup %2125 }
 0x147   : >> { %v485_v47 = vmul.f32 %v2126_v45, %v483_v42  ;;  %vm490_vm0 = vweird.f32 %v2126_v45 }
 0x148   : >> { %vm491_vm1 = vmor %vm489_vm15, %vm490_vm0  ;;  %vm641_vm15 = vcmp.eq.s32.totalorder %v637_v10, %v634_v9  ;;  %vm700_vm0 = vcmp.eq.s32.totalorder %v2510_v9, 7  ;;  %v284_v10 = vmov (%p377_p5), %v2512_v10 }
 0x149   : >> { %v486_v49 = vsub.f32 1.0, %v485_v47 }
 0x14b   : >> { %v487_v53 = vmul.f32 %v2126_v45, %v486_v49 }
 0x14d   : >> { %v488_v55 = vadd.f32 %v2126_v45, %v487_v53 }
 0x14f   : >> { %v492_v56 = vsel %vm491_vm1, %v2126_v45, %v488_v55  ;;  %vm683_vm1 = vcmp.eq.s32.totalorder %v2510_v9, 0 }
 0x150   : >> { %v497_v57 = vsel %vm494_vm3, %v496_v54, %v492_v56  ;;  %vm687_vm3 = vcmp.eq.s32.totalorder %v2510_v9, 1  ;;  %v281_v9 = vmov (%p377_p5), %v2510_v9 }
 0x151   : >> { %v504_v58 = vsel %vm503_vm4, 0.0, %v497_v57  ;;  %vm296_vm4 = vcmp.eq.s32.totalorder (%p377_p5), %v284_v10, %v281_v9  ;;  %v300_v9 = vmov (%p377_p5), %v2510_v9  ;;  %v303_v10 = vmov (%p377_p5), %v2512_v10 }
 0x152   : >> { %v505_v59 = vmul.f32 %v504_v58, %v504_v58  ;;  %v518_v60 = vmul.f32 %v504_v58, %v2551_v12  ;;  %v317_v9 = vmov (%p377_p5), %v2510_v9  ;;  %v320_v10 = vmov (%p377_p5), %v2512_v10 }
 0x153   : > { %v334_v9 = vmov (%p377_p5), %v2510_v9  ;;  %v337_v10 = vmov (%p377_p5), %v2512_v10 }
 0x154   : >> { %v506_v61 = vadd.f32 1.0, %v505_v59  ;;  %v519_v62 = vsub.f32 %v444_v19, %v518_v60  ;;  %v521_v63 = vadd.f32 %v518_v60, %v448_v20  ;;  %v792_v19 = vld [vmem:[%s2566_s20] sm:$0xff] }
 0x155   : >> { %v793_v20 = vld [vmem:[%s2568_s22] sm:$0xff] }
 0x156   : >> { %2127 = vrsqrt.f32 %v506_v61  ;;  %523 = vst [vmem:[%s522_s30] sm:$0xff] %v519_v62  ;;  %vm513_vm5 = vweird.f32 %v506_v61  ;;  %s2592_s30 = smov [#allocation13] }
 0x157   : >> { %525 = vst [vmem:[%s524_s2] sm:$0xff] %v521_v63  ;;  %s812_s2 = smov [#allocation8] }
 0x15c   : >> { %v2128_v0 = vpop.eup %2127 }
 0x15d   : >> { %v508_v1 = vmul.f32 %v2128_v0, %v506_v61  ;;  %vm514_vm6 = vweird.f32 %v2128_v0 }
 0x15e   : >> { %vm515_vm7 = vmor %vm513_vm5, %vm514_vm6  ;;  %vm349_vm5 = vcmp.eq.s32.totalorder (%p377_p5), %v337_v10, %v334_v9 }
 0x15f   : >> { %v509_v2 = vmul.f32 %v2128_v0, %v508_v1 }
 0x161   : >> { %v510_v3 = vmul.f32 0.5, %v509_v2 }
 0x163   : >> { %v511_v4 = vsub.f32 1.5, %v510_v3 }
 0x165   : >> { %v512_v5 = vmul.f32 %v2128_v0, %v511_v4 }
 0x167   : >> { %v516_v6 = vsel %vm515_vm7, %v2128_v0, %v512_v5 }
 0x168   : >> { %527 = vst [vmem:[%s526_s10] sm:$0xff] %v516_v6  ;;  %v517_v7 = vmul.f32 %v516_v6, %v504_v58  ;;  %s813_s10 = smov [#allocation10] }
 0x16a   : >> { %529 = vst [vmem:[%s528_s11] sm:$0xff] %v517_v7  ;;  %s2596_s11 = smov [#allocation9] }
 0x16f   : >> { %v531_v8 = vld [vmem:[%s530_s12] ss:$0 sm:$0xff]  ;;  %s2598_s12 = smov [#allocation11] }
 0x170   : >> { %v540_v11 = vsel %vm539_vm8, %v531_v8, 0.0  ;;  %v589_v52 = vld [vmem:[%s588_s27] ss:$0 sm:$0xff]  ;;  %s737_s27 = smov [#allocation14] }
 0x171   : >> { %541 = vadd.xlane.f32.xlu0 %v540_v11  ;;  %v546_v12 = vld [vmem:[%s545_s3] ss:$0 sm:$0xff]  ;;  %s2603_s3 = smov [#allocation12] }
 0x172   : >> { %v555_v13 = vsel %vm554_vm9, %v546_v12, 0.0  ;;  %v591_v53 = vld [vmem:[%s590_s28] ss:$0 sm:$0xff]  ;;  %s736_s28 = smov [#allocation12] }
 0x179   : >> { %556 = vadd.xlane.f32.xlu0 %v555_v13 }
 0x1e4   : >> { %v542_v14 = vpop.xlane.xlu0 %541 }
 0x1e5   : >> { %544 = vst [vmem:[%s543_s13] sm:$0xff] %v542_v14  ;;  %s595_s13 = smov [#allocation15] }
 0x1ec   : >> { %v557_v15 = vpop.xlane.xlu0 %556  ;;  %v561_v18 = vld [vmem:[%s560_s15] sm:$0xff]  ;;  %s658_s15 = smov [#allocation20] }
 0x1ed   : >> { %559 = vst [vmem:[%s558_s14] sm:$0xff] %v557_v15  ;;  %v785_v21 = vld [vmem:[%s784_s19] sm:$0xff]  ;;  %v575_v25 = vmul.f32 %v569_v16, %v561_v18  ;;  %v579_v26 = vmul.f32 %v570_v17, %v561_v18  ;;  %v572_v46 = vmul.f32 %v568_v22, %v561_v18  ;;  %v582_v48 = vmul.f32 %v571_v23, %v561_v18  ;;  %s617_s14 = smov [#allocation19]  ;;  %s631_s19 = smov [#allocation13] }
 0x1ee   : >> { %v796_v30 = vmul.f32 %v792_v19, %v785_v21  ;;  %v799_v31 = vmul.f32 %v793_v20, %v785_v21  ;;  %v803_v38 = vmul.f32 %v794_v24, %v785_v21  ;;  %v806_v42 = vmul.f32 %v795_v29, %v785_v21 }
 0x1f4   : >> { %v563_v27 = vld [vmem:[%s562_s25] sm:$0xff]  ;;  %s673_s25 = smov [#allocation13] }
 0x1f5   : >> { %v787_v28 = vld [vmem:[%s786_s1] sm:$0xff]  ;;  %v576_v32 = vmul.f32 %v571_v23, %v563_v27  ;;  %v578_v33 = vmul.f32 %v568_v22, %v563_v27  ;;  %v573_v39 = vmul.f32 %v570_v17, %v563_v27  ;;  %v581_v43 = vmul.f32 %v569_v16, %v563_v27  ;;  %s2435_s1 = smov 127  }
 0x1f6   : >> { %v797_v34 = vmul.f32 %v794_v24, %v787_v28  ;;  %v800_v35 = vmul.f32 %v795_v29, %v787_v28  ;;  %v802_v36 = vmul.f32 %v792_v19, %v787_v28  ;;  %v805_v37 = vmul.f32 %v793_v20, %v787_v28  ;;  %v624_v22 = vld [vmem:[%s617_s14] ss:$0 sm:$0xff] }
 0x1f7   : >> { %v577_v40 = vsub.f32 %v575_v25, %v576_v32  ;;  %v580_v41 = vadd.f32 %v579_v26, %v578_v33  ;;  %v574_v50 = vsub.f32 %v572_v46, %v573_v39  ;;  %v583_v51 = vadd.f32 %v582_v48, %v581_v43  ;;  %v665_v23 = vld [vmem:[%s658_s15] ss:$0 sm:$0xff] }
 0x1f8   : >> { %v798_v44 = vsub.f32 %v796_v30, %v797_v34  ;;  %v801_v45 = vsub.f32 %v799_v31, %v800_v35  ;;  %v804_v47 = vadd.f32 %v803_v38, %v802_v36  ;;  %v807_v49 = vadd.f32 %v806_v42, %v805_v37 }
 0x1f9   : >> { %585 = vst [vmem:[%s2562_s17] sm:$0xff] %v577_v40  ;;  %s657_s17 = smov [#allocation15] }
 0x1fa   : >> { %586 = vst [vmem:[%s2564_s18] sm:$0xff] %v580_v41  ;;  %s644_s18 = smov [#allocation14] }
 0x1fb   : >> { %808 = vst [vmem:[%s2566_s20] sm:$0xff] %v798_v44  ;;  %s2634_s20 = smov [#allocation12] }
 0x1fc   : >> { %809 = vst [vmem:[%s2568_s22] sm:$0xff] %v801_v45  ;;  %s2636_s22 = smov [#allocation15] }
 0x1fd   : >> { %810 = vst [vmem:[%s2572_s24] sm:$0xff] %v804_v47  ;;  %s2434_s24 = smov 1  }
 0x1fe   : >> { %811 = vst [vmem:[%s2576_s26] sm:$0xff] %v807_v49  ;;  %s2646_s26 = smov [#allocation13] }
 0x1ff   : >> { %584 = vst [vmem:[%s2560_s16] sm:$0xff] %v574_v50  ;;  %s616_s16 = smov [#allocation12] }
 0x200   : >> { %587 = vst [vmem:[%s2570_s23] sm:$0xff] %v583_v51  ;;  %v597_v55 = vld [vmem:[%s2592_s30] sm:$0xff]  ;;  %s2638_s23 = smov [#allocation14] }
 0x201   : >> { %v598_v54 = vld [vmem:[%s2590_s29] sm:$0xff]  ;;  %v601_v4 = vmul.f32 %v597_v55, %v591_v53  ;;  %v604_v12 = vmul.f32 %v597_v55, %v589_v52 }
 0x202   : >> { %v814_v56 = vld [vmem:[%s812_s2] ss:$0 sm:$0xff]  ;;  %v1613_v58 = vld [vmem:[%s812_s2 + $0x7] ss:$0 sm:$0xff]  ;;  %v609_v7 = vmul.f32 %v598_v54, %v591_v53  ;;  %v606_v8 = vmul.f32 %v598_v54, %v589_v52 }
 0x203   : >> { %v1612_v57 = vld [vmem:[%s812_s2 - $0x1] sm:$0xfe]  ;;  %v1617_v62 = vld [vmem:[%s2596_s11 + $0x7] ss:$0 sm:$0xff] }
 0x204   : >> { %v821_v59 = vsel %vm744_vm10, %v814_v56, %v1612_v57  ;;  %v838_v60 = vld [vmem:[%s2596_s11] ss:$0 sm:$0xff]  ;;  %v1615_v0 = vld [vmem:[%s813_s10 + $0x1] sm:$0x7f] }
 0x205   : >> { %v1616_v61 = vld [vmem:[%s2596_s11 - $0x1] sm:$0xfe]  ;;  %824 = vst [vmem:[%s812_s2] sm:$0xff] %v821_v59  ;;  %v833_v2 = vsel %vm756_vm11, %v1613_v58, %v1615_v0 }
 0x206   : >> { %v825_v63 = vld [vmem:[%s813_s10] ss:$0 sm:$0xff]  ;;  %v845_v1 = vsel %vm744_vm10, %v838_v60, %v1616_v61  ;;  %v1619_v3 = vld [vmem:[%s2598_s12 + $0x1] sm:$0x7f] }
 0x207   : >> { %1614 = vst [vmem:[%s812_s2 + $0x1] sm:$0x1] %v825_v63  ;;  %v849_v5 = vld [vmem:[%s2598_s12] ss:$0 sm:$0xff]  ;;  %v857_v6 = vsel %vm756_vm11, %v1617_v62, %v1619_v3  ;;  %s285_s2 = smov (%p377_p5), [#allocation12] }
 0x208   : >> { %835 = vst [vmem:[%s813_s10] sm:$0xff] %v833_v2  ;;  %v596_v11 = vld [vmem:[%s2603_s3] sm:$0xff]  ;;  %s304_s10 = smov (%p377_p5), [#allocation13] }
 0x209   : >> { %848 = vst [vmem:[%s2596_s11] sm:$0xff] %v845_v1  ;;  %v599_v13 = vld [vmem:[%s595_s13] sm:$0xff]  ;;  %v600_v14 = vmul.f32 %v596_v11, %v589_v52  ;;  %v603_v15 = vmul.f32 %v596_v11, %v591_v53 }
 0x20a   : >> { %1618 = vst [vmem:[%s2596_s11 + $0x1] sm:$0x1] %v849_v5  ;;  %v607_v16 = vmul.f32 %v599_v13, %v591_v53  ;;  %v610_v17 = vmul.f32 %v599_v13, %v589_v52  ;;  %s321_s11 = smov (%p377_p5), [#allocation14] }
 0x20b   : >> { %859 = vst [vmem:[%s2598_s12] sm:$0xff] %v857_v6  ;;  %v602_v18 = vsub.f32 %v600_v14, %v601_v4  ;;  %v605_v21 = vadd.f32 %v604_v12, %v603_v15  ;;  %s338_s12 = smov (%p377_p5), [#allocation15] }
 0x20c   : >> { %v611_v19 = vadd.f32 %v610_v17, %v609_v7  ;;  %v608_v20 = vsub.f32 %v606_v8, %v607_v16 }
 0x20d   : >> { %612 = vst [vmem:[%s2603_s3] sm:$0xff] %v602_v18 }
 0x20e   : >> { %615 = vst [vmem:[%s595_s13] sm:$0xff] %v611_v19 }
 0x20f   : >> { %614 = vst [vmem:[%s2590_s29] sm:$0xff] %v608_v20  ;;  %s761_s29 = smov [#allocation15] }
 0x210   : >> { %613 = vst [vmem:[%s2592_s30] sm:$0xff] %v605_v21  ;;  %s860_s30 = sadd.s32 (%p377_p5), 1, %s2395_s0  }
 0x211   : > { %p373_p6 = scmp.ge.s32.totalorder (%p377_p5), %s860_s30, 15  ;;  %s2731_s0 = smov (%p377_p5), %s860_s30 }
 0x214   : >> { %v625_v24 = vld [vmem:[%s616_s16] sm:$0xff] }
 0x215   : >> { %v666_v25 = vld [vmem:[%s657_s17] sm:$0xff]  ;;  %v629_v26 = vsel %vm628_vm12, %v624_v22, %v625_v24 }
 0x216   : >> { %v670_v27 = vsel %vm669_vm13, %v665_v23, %v666_v25  ;;  %v651_v28 = vld [vmem:[%s644_s18] sm:$0xff]  ;;  %630 = vst [vmem:[%s616_s16] sm:$0xff] %v629_v26 }
 0x217   : >> { %671 = vst [vmem:[%s657_s17] sm:$0xff] %v670_v27  ;;  %v655_v29 = vsel %vm654_vm14, 0.0, %v651_v28  ;;  %v638_v30 = vld [vmem:[%s631_s19] sm:$0xff] }
 0x218   : >> { %656 = vst [vmem:[%s644_s18] sm:$0xff] %v655_v29  ;;  %v642_v31 = vsel %vm641_vm15, 0.0, %v638_v30 }
 0x219   : >> { %643 = vst [vmem:[%s631_s19] sm:$0xff] %v642_v31 }
 0x21d   : >> { %v678_v32 = vld [vmem:[%s2634_s20] sm:$0xff] }
 0x21e   : >> { %v706_v33 = vld [vmem:[%s2636_s22] sm:$0xff]  ;;  %679 = vrot.lane.b32.xlu1 %v678_v32, %s2434_s24 }
 0x21f   : >> { %707 = vrot.lane.b32.xlu0 %v706_v33, %s2434_s24  ;;  %v710_v34 = vld [vmem:[%s2638_s23] sm:$0xff] }
 0x220   : >> { %711 = vrot.lane.b32.xlu2 %v710_v34, %s2434_s24  ;;  %v695_v35 = vld [vmem:[%s673_s25] sm:$0xff] }
 0x226   : >> { %675 = vrot.lane.b32.xlu1 %v695_v35, %s2434_s24 }
 0x228   : >> { %696 = vrot.lane.b32.xlu2 %v695_v35, %s2435_s1 }
 0x22e   : >> { %728 = vrot.lane.b32.xlu1 %v706_v33, %s2435_s1 }
 0x27a   : >> { %v712_v36 = vpop.permute.xlu2 %711 }
 0x27b   : >> { %v716_v44 = vsel %vm683_vm1, %v710_v34, %v712_v36 }
 0x282   : >> { %v697_v37 = vpop.permute.xlu2 %696 }
 0x283   : >> { %v701_v38 = vsel %vm700_vm0, %v678_v32, %v697_v37 }
 0x284   : >> { %703 = vst [vmem:[%s673_s25] sm:$0xff] %v701_v38 }
 0x28b   : >> { %v762_v39 = vld [vmem:[%s2646_s26] ss:$0 sm:$0xff]  ;;  %v1609_v41 = vld [vmem:[%s2646_s26 + $0x7] ss:$0 sm:$0xff] }
 0x28c   : >> { %v1608_v40 = vld [vmem:[%s2646_s26 - $0x1] sm:$0xfe] }
 0x28d   : >> { %v769_v42 = vsel %vm744_vm10, %v762_v39, %v1608_v40 }
 0x28e   : >> { %772 = vst [vmem:[%s2646_s26] sm:$0xff] %v769_v42 }
 0x290   : >> { %v680_v43 = vpop.permute.xlu1 %679 }
 0x291   : >> { %v708_v45 = vpop.permute.xlu0 %707  ;;  %v684_v48 = vsel %vm683_vm1, %v678_v32, %v680_v43 }
 0x292   : >> { %v720_v46 = vsel %vm687_vm3, %v708_v45, %v716_v44 }
 0x293   : >> { %v726_v47 = vsel %vm1391_vm2, %v720_v46, 0.0 }
 0x294   : >> { %734 = vst [vmem:[%s2638_s23] sm:$0xff] %v726_v47 }
 0x298   : >> { %v676_v49 = vpop.permute.xlu1 %675 }
 0x299   : >> { %v688_v50 = vsel %vm687_vm3, %v676_v49, %v684_v48 }
 0x29a   : >> { %v694_v51 = vsel %vm1391_vm2, %v688_v50, 0.0 }
 0x29b   : >> { %702 = vst [vmem:[%s2634_s20] sm:$0xff] %v694_v51  ;;  %v1607_v53 = vld [vmem:[%s737_s27 + $0x1] sm:$0x7f]  ;;  %v749_v60 = vld [vmem:[%s737_s27] ss:$0 sm:$0xff] }
 0x2a0   : >> { %v729_v52 = vpop.permute.xlu1 %728 }
 0x2a1   : >> { %v733_v54 = vsel %vm700_vm0, %v710_v34, %v729_v52 }
 0x2a2   : >> { %v738_v55 = vld [vmem:[%s736_s28] ss:$0 sm:$0xff]  ;;  %v1605_v57 = vld [vmem:[%s736_s28 + $0x7] ss:$0 sm:$0xff]  ;;  %735 = vst [vmem:[%s2636_s22] sm:$0xff] %v733_v54 }
 0x2a3   : >> { %v1604_v56 = vld [vmem:[%s736_s28 - $0x1] sm:$0xfe]  ;;  %v757_v59 = vsel %vm756_vm11, %v1605_v57, %v1607_v53 }
 0x2a4   : >> { %v745_v58 = vsel %vm744_vm10, %v738_v55, %v1604_v56  ;;  %759 = vst [vmem:[%s737_s27] sm:$0xff] %v757_v59 }
 0x2a5   : >> { %748 = vst [vmem:[%s736_s28] sm:$0xff] %v745_v58 }
 0x2a6   : >> { %1606 = vst [vmem:[%s736_s28 + $0x1] sm:$0x1] %v749_v60 }
 0x2a9   : >> { %v773_v61 = vld [vmem:[%s761_s29] ss:$0 sm:$0xff]  ;;  %v1611_v62 = vld [vmem:[%s761_s29 + $0x1] sm:$0x7f] }
 0x2aa   : >> { %1610 = vst [vmem:[%s2646_s26 + $0x1] sm:$0x1] %v773_v61  ;;  %v781_v63 = vsel %vm756_vm11, %v1609_v41, %v1611_v62  ;;  %379 = sbr.rel (!%p377_p5) target bundleno = 245 (0xf5), region = 435 }
 0x2ab   : >> { %783 = vst [vmem:[%s761_s29] sm:$0xff] %v781_v63  ;;  %v327_v4 = vld [vmem:[%s321_s11] sm:$0xff] (%p377_p5) }
 0x2ac   : > { %v328_v8 = vsel (%p377_p5), %vm1391_vm2, %v327_v4, 0.0 }
 0x2ad   : > { %v291_v0 = vld [vmem:[%s285_s2] sm:$0xff] (%p377_p5)  ;;  %v329_v12 = vmul.f32 (%p377_p5), %v328_v8, %v328_v8 }
 0x2ae   : > { %v292_v2 = vsel (%p377_p5), %vm1391_vm2, %v291_v0, 0.0 }
 0x2af   : > { %v293_v6 = vmul.f32 %v292_v2, %v292_v2 }
 0x2b1   : > { %v310_v1 = vld [vmem:[%s304_s10] sm:$0xff]  ;;  %v297_v15 = vsel %vm296_vm4, 0.0, %v293_v6 }
 0x2b2   : > { %v311_v3 = vsel %vm1391_vm2, %v310_v1, 0.0  ;;  %v344_v5 = vld [vmem:[%s338_s12] sm:$0xff] }
 0x2b3   : > { %v312_v7 = vmul.f32 %v311_v3, %v311_v3  ;;  %v345_v11 = vsel %vm1391_vm2, %v344_v5, 0.0 }
 0x2b4   : > { %v346_v14 = vmul.f32 %v345_v11, %v345_v11 }
 0x2b5   : > { %v314_v13 = vadd.f32 %v312_v7, %v293_v6  ;;  %v313_v17 = vadd.f32 %v312_v7, %v297_v15 }
 0x2b6   : > { %v350_v20 = vsel %vm349_vm5, 0.0, %v346_v14 }
 0x2b7   : > { %v331_v16 = vadd.f32 %v329_v12, %v314_v13  ;;  %v330_v19 = vadd.f32 %v329_v12, %v313_v17 }
 0x2b9   : > { %v352_v18 = vadd.f32 %v346_v14, %v331_v16  ;;  %v351_v21 = vadd.f32 %v350_v20, %v330_v19 }
 0x2bb   : > { %353 = vadd.xlane.f32.xlu0 %v352_v18 }
 0x2c3   : > { %361 = vadd.xlane.f32.xlu0 %v351_v21 }
 0x32e   : > { %v354_v22 = vpop.xlane.xlu0 %353 }
 0x32f   : > { %v355_v23 = vrot.slane %v354_v22, 4 }
 0x331   : > { %v356_v24 = vadd.f32 %v355_v23, %v354_v22 }
 0x333   : > { %v357_v25 = vrot.slane %v356_v24, 2 }
 0x335   : > { %v358_v29 = vadd.f32 %v357_v25, %v356_v24 }
 0x336   : > { %v362_v26 = vpop.xlane.xlu0 %361 }
 0x337   : > { %v363_v27 = vrot.slane %v362_v26, 4  ;;  %v359_v32 = vrot.slane %v358_v29, 1 }
 0x339   : > { %v364_v28 = vadd.f32 %v363_v27, %v362_v26  ;;  %v360_v35 = vadd.f32 %v359_v32, %v358_v29 }
 0x33b   : > { %v365_v30 = vrot.slane %v364_v28, 2 }
 0x33d   : > { %v366_v31 = vadd.f32 %v365_v30, %v364_v28 }
 0x33f   : > { %v367_v33 = vrot.slane %v366_v31, 1 }
 0x341   : > { %v368_v34 = vadd.f32 %v367_v33, %v366_v31 }
 0x343   : > { %1646 = vpush %v368_v34 }
 0x344   : > { %1648 = vpush %v360_v35 }
 0x374   : > { %s1647_s21 = spop %1646 }
 0x375   : > { %s1649_s3 = spop %1648 }
 0x376   : > { %s371_s13 = smul.f32 1e-10, %s1649_s3 }
 0x378   : > { %p372_p7 = scmp.le.f32.partialorder %s1647_s21, %s371_s13 }
 0x37a   : > { %p374_p8 = por %p373_p6, %p372_p7 }
 0x37c   :  { %862 = sbr.rel (!%p374_p8) target bundleno = 244 (0xf4), region = 446 }
 0x381 PF:  { %s863_s14 = smov [#allocation12]  ;;  %v867_v9 = vmov %v2510_v9  ;;  %v870_v10 = vmov %v2512_v10  ;;  %s883_s15 = smov [#allocation15] }
 0x382   :  { %v887_v9 = vmov %v2510_v9  ;;  %v890_v10 = vmov %v2512_v10  ;;  %v871_v36 = vld [vmem:[%s863_s14] sm:$0xff]  ;;  %vm874_vm6 = vcmp.eq.s32.totalorder %v870_v10, %v867_v9  ;;  %s864_s0 = smov [#allocation4]  ;;  %s884_s16 = smov [#allocation6] }
 0x383   :  { %vm894_vm7 = vcmp.eq.s32.totalorder %v890_v10, %v887_v9  ;;  %v875_v37 = vsel %vm874_vm6, %v871_v36, 0.0  ;;  %v891_v38 = vld [vmem:[%s883_s15] sm:$0xff]  ;;  %s2401_s24 = smov %s2727_s6   ;;  %s2405_s25 = smov [#allocation8]  }
 0x384   :  { %v876_v39 = vrot.slane %v875_v37, 4  ;;  %v895_v40 = vsel %vm894_vm7, %v891_v38, 0.0 }
 0x385   :  { %v896_v41 = vrot.slane %v895_v40, 4 }
 0x386   :  { %v877_v42 = vadd.f32 %v876_v39, %v875_v37 }
 0x387   :  { %v897_v43 = vadd.f32 %v896_v41, %v895_v40 }
 0x388   :  { %v878_v44 = vrot.slane %v877_v42, 2 }
 0x389   :  { %v898_v45 = vrot.slane %v897_v43, 2 }
 0x38a   :  { %v879_v46 = vadd.f32 %v878_v44, %v877_v42 }
 0x38b   :  { %v899_v47 = vadd.f32 %v898_v45, %v897_v43 }
 0x38c   :  { %v880_v48 = vrot.slane %v879_v46, 1 }
 0x38d   :  { %v900_v49 = vrot.slane %v899_v47, 1 }
 0x38e   :  { %v881_v50 = vadd.f32 %v880_v48, %v879_v46 }
 0x38f   :  { %v901_v51 = vadd.f32 %v900_v49, %v899_v47 }
 0x390   :  { %882 = vst [vmem:[%s864_s0] sm:$0x1] %v881_v50 }
 0x391   :  { %902 = vst [vmem:[%s884_s16] sm:$0x1] %v901_v51 }
 0x397   :  { %v905_v9 = vld [vmem:[#allocation4] sm:$0x1] }
 0x398   :  { %908 = vst [vmem:[#allocation5] sm:$0x1] %v905_v9  ;;  %v911_v10 = vld [vmem:[#allocation6] sm:$0x1] }
 0x399   :  { %914 = vst [vmem:[#allocation7] sm:$0x1] %v911_v10 }
 0x39f   :  { %v971_v52 = vld [vmem:[#allocation5] sm:$0x1] }
 0x3a0   :  { %972 = vst [vmem:[%s2725_s4] sm:$0x1] %v971_v52  ;;  %v1029_v53 = vld [vmem:[#allocation7] sm:$0x1] }
 0x3a1   :  { %1030 = vst [vmem:[%s2726_s5] sm:$0x1] %v1029_v53 }
 0x3a2 LB: > { %v1074_v54 = vld [vmem:[%s2407_s25] sm:$0xff]  ;;  %s1076_s25 = scalar_lea.vmem %s2407_s25, 8   ;;  %s2407_s25 = sphi %s2405_s25, %s1076_s25   ;;  %s2403_s24 = sphi %s2401_s24, %s1077_s24  }
 0x3a3   : > { %1075 = vst [vmem:[%s2403_s24] sm:$0xff] %v1074_v54  ;;  %s1077_s24 = scalar_lea.vmem %s2403_s24, 8   ;;  %p1071_p9 = scmp.gt.s32.totalorder %s1076_s25, [#allocation8] }
 0x3a4   :  { %s2409_s5 = smov (%p1071_p9), %s2728_s7   ;;  %s2413_s26 = smov (%p1071_p9), [#allocation9]  }
 0x3a5   :  { %1073 = sbr.rel (!%p1071_p9) target bundleno = 930 (0x3a2), region = 512 }
 0x3aa LB: > { %v1130_v55 = vld [vmem:[%s2415_s26] sm:$0xff]  ;;  %s1132_s26 = scalar_lea.vmem %s2415_s26, 8   ;;  %s2415_s26 = sphi %s2413_s26, %s1132_s26   ;;  %s2411_s5 = sphi %s2409_s5, %s1133_s5  }
 0x3ab   : > { %1131 = vst [vmem:[%s2411_s5] sm:$0xff] %v1130_v55  ;;  %s1133_s5 = scalar_lea.vmem %s2411_s5, 8   ;;  %p1127_p10 = scmp.gt.s32.totalorder %s1132_s26, [#allocation9] }
 0x3ac   :  { %s2417_s28 = smov (%p1127_p10), %s2729_s8   ;;  %s2421_s29 = smov (%p1127_p10), [#allocation10]  }
 0x3ad   :  { %1129 = sbr.rel (!%p1127_p10) target bundleno = 938 (0x3aa), region = 534 }
 0x3b2 LB: > { %v1186_v56 = vld [vmem:[%s2423_s29] sm:$0xff]  ;;  %s1188_s29 = scalar_lea.vmem %s2423_s29, 8   ;;  %s2423_s29 = sphi %s2421_s29, %s1188_s29   ;;  %s2419_s28 = sphi %s2417_s28, %s1189_s28  }
 0x3b3   : > { %1187 = vst [vmem:[%s2419_s28] sm:$0xff] %v1186_v56  ;;  %s1189_s28 = scalar_lea.vmem %s2419_s28, 8   ;;  %p1183_p11 = scmp.gt.s32.totalorder %s1188_s29, [#allocation10] }
 0x3b4   :  { %s2425_s2 = smov (%p1183_p11), %s2730_s9   ;;  %s2429_s10 = smov (%p1183_p11), [#allocation11]  }
 0x3b5   :  { %1185 = sbr.rel (!%p1183_p11) target bundleno = 946 (0x3b2), region = 556 }
 0x3ba LB: > { %v1242_v57 = vld [vmem:[%s2431_s10] sm:$0xff]  ;;  %s1244_s10 = scalar_lea.vmem %s2431_s10, 8   ;;  %s2431_s10 = sphi %s2429_s10, %s1244_s10   ;;  %s2427_s2 = sphi %s2425_s2, %s1245_s2  }
 0x3bb   : > { %1243 = vst [vmem:[%s2427_s2] sm:$0xff] %v1242_v57  ;;  %s1245_s2 = scalar_lea.vmem %s2427_s2, 8   ;;  %p1239_p12 = scmp.gt.s32.totalorder %s1244_s10, [#allocation11] }
 0x3bd   :  { %1241 = sbr.rel (!%p1239_p12) target bundleno = 954 (0x3ba), region = 578 }

// kernel: eagsrnet_forward.6
= control target key start
LH: loop header
LB: loop body
LE: loop exit
PB: predicated region body
PF: predicated region fallthrough
CT: control target
= control target key end

     0   :  { %vm60_vm0 = vcmask 1043456   ;;  %vm56_vm1 = vcmask 97280   ;;  %v639_v6 = vmov 0   ;;  %vm143_vm2 = vcmask 1045504   ;;  %s896_s1 = inlined_call_operand.vmem [shape: f32[12,12], index: 1, kind: input, shape index: {}]   ;;  %s897_s6 = inlined_call_operand.vmem [shape: f32[6,12], index: 6, kind: input, shape index: {}]   ;;  %s898_s3 = inlined_call_operand.vmem [shape: f32[12,32], index: 3, kind: input, shape index: {}]   ;;  %s899_s7 = inlined_call_operand.vmem [shape: f32[6,1], index: 7, kind: input, shape index: {}]   ;;  %s900_s8 = inlined_call_operand.vmem [shape: f32[32,32], index: 8, kind: input, shape index: {}]   ;;  %s901_s9 = inlined_call_operand.vmem [shape: f32[1,32], index: 9, kind: input, shape index: {}]   ;;  %s902_s5 = inlined_call_operand.vmem [shape: f32[12,16], index: 5, kind: input, shape index: {}]   ;;  %s903_s10 = inlined_call_operand.vmem [shape: f32[32,32], index: 10, kind: input, shape index: {}]   ;;  %s904_s12 = inlined_call_operand.vmem [shape: f32[1,32], index: 12, kind: input, shape index: {}]   ;;  %s905_s11 = inlined_call_operand.vmem [shape: f32[32,32], index: 11, kind: input, shape index: {}]   ;;  %s906_s0 = inlined_call_operand.vmem [shape: f32[16,16], index: 0, kind: input, shape index: {}]   ;;  %s907_s13 = inlined_call_operand.vmem [shape: f32[1,32], index: 13, kind: input, shape index: {}]   ;;  %s908_s4 = inlined_call_operand.vmem [shape: f32[16,32], index: 4, kind: input, shape index: {}]   ;;  %s909_s14 = inlined_call_operand.vmem [shape: f32[64,32], index: 14, kind: input, shape index: {}]   ;;  %s910_s2 = inlined_call_operand.vmem [shape: f32[16,32], index: 2, kind: input, shape index: {}]   ;;  %s911_s15 = inlined_call_operand.vmem [shape: f32[1,32], index: 15, kind: input, shape index: {}]   ;;  %s912_s16 = inlined_call_operand.vmem [shape: f32[16,32], index: 16, kind: output, shape index: {}]  }
   0x1   :  { %914 = sst [smem:[#allocation2_spill]] %s896_s1  ;;  %v53_v2 = vld [vmem:[%s897_s6] sm:$0x3f]  ;;  %v744_v3 = vld [vmem:[%s898_s3 + $0x8] sm:$0xf]  ;;  %634 = vset.pattern.permute.xlu0 %v639_v6  ;;  %v170_v11 = vld [vmem:[%s900_s8 + $0x18] sm:$0xff] }
   0x2   :  { %s915_s23 = sld [smem:[#allocation2_spill]]  ;;  %600 = vmatpush.xpose.msk.msra.mxu1 %vm56_vm1, %v53_v2  ;;  %v751_v4 = vld [vmem:[%s898_s3] sm:$0xff]  ;;  %v169_v12 = vld [vmem:[%s900_s8 + $0x10] sm:$0xff]  ;;  %v168_v13 = vld [vmem:[%s900_s8 + $0x8] sm:$0xff]  ;;  %vm139_vm3 = vcmask 48128   ;;  %vm175_vm4 = vcmask 261120  }
   0x3   :  { %v132_v5 = vld [vmem:[%s899_s7] sm:$0x3f]  ;;  %v297_v23 = vld [vmem:[%s903_s10 + $0x18] sm:$0xff]  ;;  %v296_v24 = vld [vmem:[%s903_s10 + $0x10] sm:$0xff]  ;;  %vm401_vm5 = vcmask 130048  }
   0x4   :  { %135 = vperm.xlu0 %634, %v132_v5   ;;  %v167_v15 = vld [vmem:[%s900_s8] sm:$0xff]  ;;  %v295_v25 = vld [vmem:[%s903_s10 + $0x8] sm:$0xff]  ;;  %v434_v41 = vld [vmem:[%s905_s11 + $0x18] sm:$0xff] }
   0x5   :  { %v635_v17 = vld [vmem:[%s901_s9] ss:$0 sm:$0xff]  ;;  %v334_v26 = vld [vmem:[%s902_s5 + $0x8] sm:$0xf]  ;;  %v433_v42 = vld [vmem:[%s905_s11 + $0x10] sm:$0xff] }
   0x6   :  { %v333_v22 = vld [vmem:[%s902_s5] sm:$0xff]  ;;  %v432_v43 = vld [vmem:[%s905_s11 + $0x8] sm:$0xff]  ;;  %v479_v53 = vld [vmem:[%s909_s14 + $0x38] sm:$0xff] }
   0x7   :  { %337 = vxpose.xlu1.b32.start [1/2] (short) (narrow) %v333_v22, 16  ;;  %v294_v29 = vld [vmem:[%s903_s10] sm:$0xff]  ;;  %v336_v47 = vld [vmem:[%s906_s0 + $0x8] sm:$0xff]  ;;  %v475_v54 = vld [vmem:[%s909_s14 + $0x18] sm:$0xff] }
   0x8   :  { %v728_v0 = vld [vmem:[%s915_s23 + $0x8] sm:$0xf]  ;;  %v733_v1 = vld [vmem:[%s915_s23] sm:$0xff]  ;;  %v478_v55 = vld [vmem:[%s909_s14 + $0x30] sm:$0xff] }
   0x9   :  { %598 = vmatpush.msk.msra.mxu2 %vm60_vm0, %v728_v0  ;;  %v636_v33 = vld [vmem:[%s904_s12] ss:$0 sm:$0xff]  ;;  %v504_v51 = vld [vmem:[%s908_s4 + $0x8] sm:$0xff]  ;;  %v474_v56 = vld [vmem:[%s909_s14 + $0x10] sm:$0xff] }
   0xa   :  { %v335_v46 = vld [vmem:[%s906_s0] sm:$0xff]  ;;  %v477_v57 = vld [vmem:[%s909_s14 + $0x28] sm:$0xff] }
   0xb   :  { %79 = vmatpush.msra.mxu2 %v733_v1  ;;  %v431_v48 = vld [vmem:[%s905_s11] sm:$0xff]  ;;  %v473_v58 = vld [vmem:[%s909_s14 + $0x8] sm:$0xff] }
   0xc   :  { %599 = vmatmul.msk.f32.vlgmr.msra.gmra.mxu2 %vm56_vm1, %v53_v2  ;;  %v503_v52 = vld [vmem:[%s908_s4] sm:$0xff] }
   0xd   :  { %602 = vmatpush.msk.msrb.mxu2 %vm60_vm0, %v744_v3  ;;  %v476_v59 = vld [vmem:[%s909_s14 + $0x20] sm:$0xff] }
   0xe   :  { %v472_v60 = vld [vmem:[%s909_s14] sm:$0xff] }
   0xf   :  { %127 = vmatpush.msrb.mxu2 %v751_v4  ;;  %338 = vxpose.xlu1.b32.end [2/2] (short) (narrow) %v334_v26, 16  ;;  %v637_v62 = vld [vmem:[%s907_s13] ss:$0 sm:$0xff] }
  0x11   :  { %320 = vmatpush.msra.mxu2 %v297_v23 }
  0x13   :  { %321 = vmatpush.msra.mxu2 %v296_v24 }
  0x14   :  { %603 = vmatmul.msk.f32.vlgmr.msrb.gmra.mxu2 %vm56_vm1, %v53_v2 }
  0x15   :  { %322 = vmatpush.msra.mxu2 %v295_v25 }
  0x17   :  { %323 = vmatpush.msra.mxu2 %v294_v29 }
  0x26   :  { %199 = vxpose.xlu0.b32.start.end [1/1] (short) (narrow) %v53_v2, 16 }
  0x76   :  { %v136_v8 = vpop.permute.xlu0 %135 }
  0x8f   :  { %v81_v7 = vpop.f32.mrf.mxu2 }
  0x90   :  { %601 = vmatmul.msk.f32.vlgmr.msra.gmra.mxu1 %vm56_vm1, %v81_v7 }
  0x97   :  { %v129_v9 = vpop.f32.mrf.mxu2 }
  0x98   :  { %v138_v10 = vmul.f32 %v136_v8, %v129_v9 }
  0x9a   :  { %604 = vmatpush.msk.msra.mxu3 %vm143_vm2, %v138_v10 }
  0x9c   :  { %191 = vmatpush.msrb.mxu3 %v170_v11  ;;  %v638_v11 = vld [vmem:[%s911_s15] ss:$0 sm:$0xff] }
  0x9e   :  { %192 = vmatpush.msrb.mxu3 %v169_v12 }
  0xa0   :  { %193 = vmatpush.msrb.mxu3 %v168_v13 }
  0xa2   :  { %194 = vmatpush.msrb.mxu3 %v167_v15 }
  0xab   :  { %v353_v38 = vpop.trf.xlu1 }
  0xb3   :  { %v354_v40 = vpop.trf.xlu1 }
  0xca   :  { %v215_v18 = vpop.trf.xlu0 }
  0xd2   :  { %v216_v21 = vpop.trf.xlu0 }
 0x10d   :  { %v104_v14 = vpop.f32.mrf.mxu1 }
 0x10e   :  { %605 = vmatmul.msk.f32.vlgmr.msra.gmra.mxu3 %vm139_vm3, %v104_v14 }
 0x191   :  { %v164_v16 = vpop.f32.mrf.mxu3 }
 0x192   :  { %606 = vmatmul.msk.f32.vlgmr.msrb.gmra.mxu3 %vm175_vm4, %v164_v16 }
 0x215   :  { %v196_v19 = vpop.f32.mrf.mxu3 }
 0x216   :  { %v197_v20 = vadd.f32 %v635_v17, %v196_v19 }
 0x218   :  { %607 = vmatpush.msk.msra.mxu0 %vm143_vm2, %v197_v20 }
 0x219   :  { %608 = vmatmul.msk.f32.vlgmr.msra.gmra.mxu0 %vm139_vm3, %v215_v18 }
 0x221   :  { %609 = vmatmul.msk.f32.gmra.mxu0 %vm139_vm3, %v216_v21 }
 0x296   :  { %v257_v27 = vpop.f32.mrf.mxu0 }
 0x29e   :  { %v260_v28 = vpop.f32.mrf.mxu0 }
 0x29f   :  { %610 = vmatpush.msk.msrb.mxu0 %vm60_vm0, %v260_v28  ;;  %630 = vmatpush.msk.msrb.mxu1 %vm60_vm0, %v260_v28 }
 0x2a1   :  { %286 = vmatpush.msrb.mxu0 %v257_v27  ;;  %631 = vmatpush.msrb.mxu1 %v257_v27 }
 0x2a2   :  { %611 = vmatmul.msk.f32.vlgmr.msrb.gmra.mxu0 %vm56_vm1, %v733_v1  ;;  %612 = vmatmul.msk.f32.vlgmr.msrb.gmra.mxu1 %vm56_vm1, %v728_v0  ;;  %v469_v0 = vld [vmem:[%s910_s2 + $0x8] sm:$0xff] }
 0x2a3   :  { %457 = vmatpush.msra.mxu1 %v434_v41 }
 0x2a5   :  { %458 = vmatpush.msra.mxu1 %v433_v42 }
 0x2a7   :  { %459 = vmatpush.msra.mxu1 %v432_v43 }
 0x2a9   :  { %460 = vmatpush.msra.mxu1 %v431_v48 }
 0x2ab   :  { %575 = vmatpush.msrb.mxu1 %v475_v54 }
 0x2ad   :  { %576 = vmatpush.msrb.mxu1 %v474_v56 }
 0x2af   :  { %577 = vmatpush.msrb.mxu1 %v473_v58 }
 0x2b1   :  { %578 = vmatpush.msrb.mxu1 %v472_v60 }
 0x31f   :  { %v288_v30 = vpop.f32.mrf.mxu0  ;;  %v291_v31 = vpop.f32.mrf.mxu1 }
 0x320   :  { %613 = vmatmul.msk.f32.vlgmr.msra.gmra.mxu2 %vm175_vm4, %v288_v30 }
 0x328   :  { %614 = vmatmul.msk.f32.gmra.mxu2 %vm175_vm4, %v291_v31 }
 0x3a3   :  { %v325_v32 = vpop.f32.mrf.mxu2 }
 0x3a4   :  { %v326_v35 = vadd.f32 %v636_v33, %v325_v32 }
 0x3a6   :  { %v331_v39 = vadd.f32 %v326_v35, %v751_v4 }
 0x3ab   :  { %v328_v34 = vpop.f32.mrf.mxu2 }
 0x3ac   :  { %v329_v36 = vadd.f32 %v636_v33, %v328_v34 }
 0x3ae   :  { %v332_v37 = vadd.f32 %v329_v36, %v744_v3  ;;  %v468_v3 = vld [vmem:[%s910_s2] sm:$0xff] }
 0x3b0   :  { %615 = vmatpush.msk.msra.mxu3 %vm60_vm0, %v332_v37 }
 0x3b2   :  { %393 = vmatpush.msra.mxu3 %v331_v39 }
 0x3b3   :  { %616 = vmatmul.msk.f32.vlgmr.msra.gmra.mxu3 %vm56_vm1, %v353_v38 }
 0x3b4   :  { %519 = vmatpush.msrb.mxu3 %v504_v51 }
 0x3b6   :  { %520 = vmatpush.msrb.mxu3 %v503_v52 }
 0x3bb   :  { %617 = vmatmul.msk.f32.gmra.mxu3 %vm56_vm1, %v354_v40 }
 0x3c3   :  { %624 = vmatmul.msk.f32.vlgmr.msrb.gmra.mxu3 %vm401_vm5, %v335_v46 }
 0x3cb   :  { %625 = vmatmul.msk.f32.gmra.mxu3 %vm401_vm5, %v336_v47 }
 0x436   :  { %v395_v44 = vpop.f32.mrf.mxu3 }
 0x43e   :  { %v398_v45 = vpop.f32.mrf.mxu3 }
 0x43f   :  { %422 = vmatpush.msra.mxu0 %v398_v45 }
 0x441   :  { %423 = vmatpush.msra.mxu0 %v395_v44 }
 0x442   :  { %618 = vmatmul.msk.f32.vlgmr.msra.gmra.mxu0 %vm401_vm5, %v335_v46 }
 0x443   :  { %546 = vmatpush.msrb.mxu0 %v479_v53 }
 0x445   :  { %547 = vmatpush.msrb.mxu0 %v478_v55 }
 0x446   :  { %v522_v6 = vpop.f32.mrf.mxu3 }
 0x447   :  { %548 = vmatpush.msrb.mxu0 %v477_v57 }
 0x449   :  { %549 = vmatpush.msrb.mxu0 %v476_v59 }
 0x44a   :  { %619 = vmatmul.msk.f32.gmra.mxu0 %vm401_vm5, %v336_v47 }
 0x44e   :  { %v525_v7 = vpop.f32.mrf.mxu3 }
 0x452   :  { %626 = vmatmul.msk.f32.vlgmr.msrb.gmra.mxu0 %vm175_vm4, %v522_v6 }
 0x45a   :  { %627 = vmatmul.msk.f32.gmra.mxu0 %vm175_vm4, %v525_v7 }
 0x4bf   :  { %v425_v49 = vpop.f32.mrf.mxu0 }
 0x4c0   :  { %620 = vmatmul.msk.f32.vlgmr.msra.gmra.mxu1 %vm175_vm4, %v425_v49 }
 0x4c7   :  { %v428_v50 = vpop.f32.mrf.mxu0 }
 0x4c8   :  { %621 = vmatmul.msk.f32.gmra.mxu1 %vm175_vm4, %v428_v50 }
 0x4cf   :  { %v551_v10 = vpop.f32.mrf.mxu0 }
 0x4d7   :  { %v554_v15 = vpop.f32.mrf.mxu0 }
 0x53d   :  { %v462_v61 = vpop.f32.mrf.mxu1 }
 0x53e   :  { %v463_v1 = vadd.f32 %v637_v62, %v462_v61 }
 0x540   :  { %v470_v5 = vadd.f32 %v468_v3, %v463_v1 }
 0x545   :  { %v465_v63 = vpop.f32.mrf.mxu1 }
 0x546   :  { %v466_v2 = vadd.f32 %v637_v62, %v465_v63 }
 0x548   :  { %v471_v4 = vadd.f32 %v469_v0, %v466_v2 }
 0x54a   :  { %494 = vmatpush.msrb.mxu2 %v471_v4 }
 0x54c   :  { %495 = vmatpush.msrb.mxu2 %v470_v5 }
 0x54d   :  { %622 = vmatmul.msk.f32.vlgmr.msrb.gmra.mxu2 %vm401_vm5, %v335_v46 }
 0x555   :  { %623 = vmatmul.msk.f32.gmra.mxu2 %vm401_vm5, %v336_v47 }
 0x5d0   :  { %v497_v8 = vpop.f32.mrf.mxu2 }
 0x5d1   :  { %628 = vmatmul.msk.f32.vlgmr.msrb.gmra.mxu1 %vm175_vm4, %v497_v8 }
 0x5d8   :  { %v500_v9 = vpop.f32.mrf.mxu2 }
 0x5d9   :  { %629 = vmatmul.msk.f32.gmra.mxu1 %vm175_vm4, %v500_v9 }
 0x64e   :  { %v580_v12 = vpop.f32.mrf.mxu1 }
 0x64f   :  { %v581_v13 = vadd.f32 %v580_v12, %v551_v10 }
 0x651   :  { %v590_v14 = vadd.f32 %v638_v11, %v581_v13 }
 0x653   :  { %592 = vst.msk [vmem:[%s912_s16] sm:$0xff] %vm175_vm4, %v590_v14 }
 0x656   :  { %v583_v16 = vpop.f32.mrf.mxu1 }
 0x657   :  { %v584_v17 = vadd.f32 %v583_v16, %v554_v15 }
 0x659   :  { %v591_v18 = vadd.f32 %v638_v11, %v584_v17 }
 0x65b   :  { %593 = vst.msk [vmem:[%s912_s16 + $0x8] sm:$0xff] %vm175_vm4, %v591_v18 }

// kernel: eagsrnet_forward.7
= control target key start
LH: loop header
LB: loop body
LE: loop exit
PB: predicated region body
PF: predicated region fallthrough
CT: control target
= control target key end

     0   :  { %16 = vsyncpa [#allocation3], 0  ;;  %vm73_vm0 = vcmask 130048   ;;  %s760_s17 = smov 112   ;;  %s1044_s0 = inlined_call_operand.vmem [shape: f32[32,32], index: 0, kind: input, shape index: {}]   ;;  %s1045_s1 = inlined_call_operand.vmem [shape: f32[16,16], index: 1, kind: input, shape index: {}]   ;;  %s1046_s2 = inlined_call_operand.vmem [shape: f32[16,32], index: 2, kind: input, shape index: {}]   ;;  %s1047_s3 = inlined_call_operand.vmem [shape: f32[1,32], index: 3, kind: input, shape index: {}]   ;;  %s1048_s4 = inlined_call_operand.vmem [shape: f32[1,32], index: 4, kind: input, shape index: {}]   ;;  %s1049_s5 = inlined_call_operand.vmem [shape: f32[32,32], index: 5, kind: input, shape index: {}]   ;;  %s1050_s6 = inlined_call_operand.vmem [shape: f32[1,32], index: 6, kind: input, shape index: {}]   ;;  %s1051_s7 = inlined_call_operand.vmem [shape: f32[1,32], index: 7, kind: input, shape index: {}]   ;;  %s1052_s8 = inlined_call_operand.vmem [shape: f32[32,32], index: 8, kind: input, shape index: {}]   ;;  %s1053_s9 = inlined_call_operand.hbm [shape: f32[32,32], index: 9, kind: output, shape index: {0}]   ;;  %s1054_s10 = inlined_call_operand.hbm [shape: f32[32,32], index: 10, kind: output, shape index: {1}]  }
   0x1   :  { %v47_v0 = vld [vmem:[%s1044_s0] sm:$0xff]  ;;  %v49_v1 = vld [vmem:[%s1044_s0 + $0x10] sm:$0xff]  ;;  %v72_v2 = vld [vmem:[%s1045_s1 + $0x8] sm:$0xff] }
   0x2   :  { %55 = vrot.lane.b32.xlu0 %v47_v0, %s760_s17  ;;  %59 = vrot.lane.b32.xlu1 %v49_v1, %s760_s17  ;;  %v71_v3 = vld [vmem:[%s1045_s1] sm:$0xff] }
   0x3   :  { %651 = vmatpush.xpose.msk.msra.mxu0 %vm73_vm0, %v72_v2  ;;  %685 = vmatpush.xpose.msk.msra.mxu2 %vm73_vm0, %v72_v2 }
   0x4   :  { %17 = vsyncpa [#allocation5], 0  ;;  %v48_v4 = vld [vmem:[%s1044_s0 + $0x8] sm:$0xff]  ;;  %v50_v5 = vld [vmem:[%s1044_s0 + $0x18] sm:$0xff]  ;;  %v36_v20 = vlaneseq  ;;  %vm172_vm2 = vcmask 261120   ;;  %v761_v52 = vmov 32.0  }
   0x5   :  { %v122_v6 = vld [vmem:[%s1046_s2 + $0x8] sm:$0xff]  ;;  %v121_v15 = vld [vmem:[%s1046_s2] sm:$0xff]  ;;  %702 = vrcp.f32 %v761_v52  ;;  %s621_s1 = sshll.u32 %s1053_s9, 4  ;;  %s763_s2 = smov 128   ;;  %s622_s1 = int_to_ptr.hbm [resolvable:$true] %s621_s1 }
   0x6   :  { %149 = vmatpush.msra.mxu1 %v122_v6  ;;  %v857_v21 = vshrl.u32 %v36_v20, 7  ;;  %v859_v22 = vand.u32 127, %v36_v20  ;;  %v341_v20 = vld [vmem:[%s1049_s5 + $0x8] sm:$0xff]  ;;  %s764_s28 = smov 8   ;;  %s765_s9 = smov [#allocation4]  }
   0x7   :  { %652 = vmatpush.xpose.msk.msra.mxu0 %vm73_vm0, %v71_v3  ;;  %686 = vmatpush.xpose.msk.msra.mxu2 %vm73_vm0, %v71_v3  ;;  %s632_s29 = sshll.u32 %s765_s9, 4  ;;  %s634_s12 = sshll.u32 %s1054_s10, 4  ;;  %s633_s29 = int_to_ptr.vmem [resolvable:$true] %s632_s29  ;;  %s635_s12 = int_to_ptr.hbm [resolvable:$true] %s634_s12 }
   0x8   :  { %150 = vmatpush.msra.mxu1 %v121_v15  ;;  %vm43_vm1 = vcmp.eq.s32.totalorder %v857_v21, %v859_v22  ;;  %v871_v26 = vadd.s32 8, %v857_v21  ;;  %v883_v30 = vadd.s32 16, %v857_v21  ;;  %v895_v34 = vadd.s32 24, %v857_v21 }
   0xa   :  { %57 = vrot.lane.b32.xlu0 %v48_v4, %s760_s17  ;;  %61 = vrot.lane.b32.xlu1 %v50_v5, %s760_s17  ;;  %vm44_vm3 = vcmp.eq.s32.totalorder %v871_v26, %v859_v22  ;;  %vm45_vm4 = vcmp.eq.s32.totalorder %v883_v30, %v859_v22  ;;  %vm46_vm5 = vcmp.eq.s32.totalorder %v895_v34, %v859_v22 }
   0xb   :  { %v703_v59 = vpop.eup %702 }
   0xc   :  { %vm284_vm6 = vweird.f32 %v703_v59 }
  0x74   :  { %v56_v7 = vpop.permute.xlu0 %55  ;;  %v60_v11 = vpop.permute.xlu1 %59 }
  0x75   :  { %v67_v8 = vadd.f32 %v56_v7, %v47_v0  ;;  %v69_v12 = vadd.f32 %v60_v11, %v49_v1  ;;  %v280_v1 = vmul.f32 32.0, %v703_v59 }
  0x77   :  { %653 = vmatmul.msk.f32.vlgmr.msra.gmra.mxu0 %vm73_vm0, %v67_v8  ;;  %v281_v6 = vsub.f32 1.0, %v280_v1 }
  0x7c   :  { %v58_v9 = vpop.permute.xlu0 %57  ;;  %v62_v13 = vpop.permute.xlu1 %61 }
  0x7d   :  { %v68_v10 = vadd.f32 %v58_v9, %v48_v4  ;;  %v70_v14 = vadd.f32 %v62_v13, %v50_v5 }
  0x7f   :  { %654 = vmatmul.msk.f32.vlgmr.msra.gmra.mxu2 %vm73_vm0, %v68_v10  ;;  %v282_v10 = vmul.f32 %v703_v59, %v281_v6 }
  0x81   :  { %v283_v13 = vadd.f32 %v703_v59, %v282_v10 }
  0x87   :  { %655 = vmatmul.msk.f32.gmra.mxu2 %vm73_vm0, %v69_v12 }
  0x8f   :  { %656 = vmatmul.msk.f32.gmra.mxu2 %vm73_vm0, %v70_v14 }
  0xf4   :  { %v109_v16 = vpop.f32.mrf.mxu0 }
  0xf5   :  { %657 = vmatmul.msk.f32.vlgmr.msra.gmra.mxu1 %vm73_vm0, %v109_v16  ;;  %v938_v16 = vsel %vm284_vm6, %v703_v59, %v283_v13  ;;  %v698_v59 = vld [vmem:[%s1047_s3] ss:$0 sm:$0xff] }
 0x102   :  { %v112_v17 = vpop.f32.mrf.mxu2 }
 0x103   :  { %658 = vmatmul.msk.f32.gmra.mxu1 %vm73_vm0, %v112_v17  ;;  %v343_v17 = vld [vmem:[%s1049_s5 + $0x18] sm:$0xff] }
 0x104   :  { %368 = vmatpush.msrb.mxu0 %v343_v17  ;;  %687 = vmatpush.msra.mxu3 %v343_v17 }
 0x10a   :  { %v115_v18 = vpop.f32.mrf.mxu2 }
 0x10b   :  { %659 = vmatmul.msk.f32.gmra.mxu1 %vm73_vm0, %v115_v18  ;;  %v342_v18 = vld [vmem:[%s1049_s5 + $0x10] sm:$0xff] }
 0x10c   :  { %369 = vmatpush.msrb.mxu0 %v342_v18  ;;  %688 = vmatpush.msra.mxu3 %v342_v18 }
 0x10e   :  { %370 = vmatpush.msrb.mxu0 %v341_v20  ;;  %689 = vmatpush.msra.mxu3 %v341_v20 }
 0x112   :  { %v118_v19 = vpop.f32.mrf.mxu2 }
 0x113   :  { %660 = vmatmul.msk.f32.gmra.mxu1 %vm73_vm0, %v118_v19 }
 0x172   :  { %v152_v23 = vpop.f32.mrf.mxu1 }
 0x173   :  { %v164_v24 = vand.u32 2147483647, %v152_v23 }
 0x175   :  { %v866_v25 = vsel %vm43_vm1, 1.0, %v164_v24  ;;  %v340_v24 = vld [vmem:[%s1049_s5] sm:$0xff] }
 0x176   :  { %173 = vst.msk [vmem:[#allocation2] sm:$0xff] %vm172_vm2, %v866_v25  ;;  %371 = vmatpush.msrb.mxu0 %v340_v24  ;;  %690 = vmatpush.msra.mxu3 %v340_v24 }
 0x180   :  { %v155_v27 = vpop.f32.mrf.mxu1 }
 0x181   :  { %v165_v28 = vand.u32 2147483647, %v155_v27 }
 0x183   :  { %v878_v29 = vsel %vm44_vm3, 1.0, %v165_v28 }
 0x184   :  { %174 = vst.msk [vmem:[#allocation2 + $0x8] sm:$0xff] %vm172_vm2, %v878_v29 }
 0x188   :  { %v158_v31 = vpop.f32.mrf.mxu1 }
 0x189   :  { %v166_v32 = vand.u32 2147483647, %v158_v31 }
 0x18b   :  { %v890_v33 = vsel %vm45_vm4, 1.0, %v166_v32 }
 0x18c   :  { %175 = vst.msk [vmem:[#allocation2 + $0x10] sm:$0xff] %vm172_vm2, %v890_v33 }
 0x190   :  { %v161_v35 = vpop.f32.mrf.mxu1 }
 0x191   :  { %v167_v36 = vand.u32 2147483647, %v161_v35 }
 0x193   :  { %v902_v37 = vsel %vm46_vm5, 1.0, %v167_v36 }
 0x194   :  { %176 = vst.msk [vmem:[#allocation2 + $0x18] sm:$0xff] %vm172_vm2, %v902_v37  ;;  %661 = vmatpush.xpose.msk.msrb.mxu2 %vm172_vm2, %v902_v37 }
 0x198   :  { %662 = vmatpush.xpose.msk.msrb.mxu2 %vm172_vm2, %v890_v33 }
 0x19c   :  { %663 = vmatpush.xpose.msk.msrb.mxu2 %vm172_vm2, %v878_v29 }
 0x1a0   :  { %664 = vmatpush.xpose.msk.msrb.mxu2 %vm172_vm2, %v866_v25 }
 0x1a3   :  { %665 = vmatmul.msk.f32.vlgmr.msrb.gmra.mxu2 %vm172_vm2, %v866_v25 }
 0x1ab   :  { %666 = vmatmul.msk.f32.gmra.mxu2 %vm172_vm2, %v878_v29 }
 0x1b3   :  { %667 = vmatmul.msk.f32.gmra.mxu2 %vm172_vm2, %v890_v33 }
 0x1bb   :  { %668 = vmatmul.msk.f32.gmra.mxu2 %vm172_vm2, %v902_v37 }
 0x226   :  { %v206_v38 = vpop.f32.mrf.mxu2 }
 0x227   :  { %218 = vxpose.xlu2.b32.start [1/4] (short) (narrow) %v206_v38, 32 }
 0x22e   :  { %v209_v39 = vpop.f32.mrf.mxu2 }
 0x22f   :  { %219 = vxpose.xlu2.b32.cont [2/4] (short) (narrow) %v209_v39, 32 }
 0x236   :  { %v212_v40 = vpop.f32.mrf.mxu2 }
 0x237   :  { %220 = vxpose.xlu2.b32.cont [3/4] (short) (narrow) %v212_v40, 32 }
 0x23e   :  { %v215_v41 = vpop.f32.mrf.mxu2 }
 0x23f   :  { %221 = vxpose.xlu2.b32.end [4/4] (short) (narrow) %v215_v41, 32 }
 0x2c0   :  { %v234_v42 = vpop.trf.xlu2 }
 0x2c1   :  { %v250_v45 = vadd.f32 %v234_v42, %v206_v38 }
 0x2c3   :  { %v254_v48 = vmul.f32 0.5, %v250_v45 }
 0x2c5   :  { %v258_v53 = vsel %vm43_vm1, 1.0, %v254_v48 }
 0x2c6   :  { %v262_v56 = vand.u32 2147483647, %v258_v53 }
 0x2c8   :  { %v235_v43 = vpop.trf.xlu2  ;;  %v266_v63 = vsel %vm172_vm2, %v262_v56, 0.0 }
 0x2c9   :  { %v251_v44 = vadd.f32 %v235_v43, %v209_v39 }
 0x2cb   :  { %v255_v46 = vmul.f32 0.5, %v251_v44 }
 0x2cd   :  { %v259_v50 = vsel %vm44_vm3, 1.0, %v255_v46 }
 0x2ce   :  { %v263_v55 = vand.u32 2147483647, %v259_v50 }
 0x2d0   :  { %v236_v47 = vpop.trf.xlu2  ;;  %v267_v61 = vsel %vm172_vm2, %v263_v55, 0.0 }
 0x2d1   :  { %v252_v49 = vadd.f32 %v236_v47, %v212_v40  ;;  %v268_v2 = vadd.f32 %v267_v61, %v266_v63  ;;  %v699_v63 = vld [vmem:[%s1048_s4] ss:$0 sm:$0xff] }
 0x2d3   :  { %v256_v51 = vmul.f32 0.5, %v252_v49 }
 0x2d5   :  { %v260_v54 = vsel %vm45_vm4, 1.0, %v256_v51 }
 0x2d6   :  { %v264_v57 = vand.u32 2147483647, %v260_v54 }
 0x2d8   :  { %v237_v58 = vpop.trf.xlu2  ;;  %v269_v0 = vsel %vm172_vm2, %v264_v57, 0.0 }
 0x2d9   :  { %v253_v60 = vadd.f32 %v237_v58, %v215_v41  ;;  %v270_v5 = vadd.f32 %v269_v0, %v268_v2 }
 0x2db   :  { %v257_v62 = vmul.f32 0.5, %v253_v60 }
 0x2dd   :  { %v261_v3 = vsel %vm46_vm5, 1.0, %v257_v62 }
 0x2de   :  { %v265_v4 = vand.u32 2147483647, %v261_v3 }
 0x2e0   :  { %v271_v7 = vsel %vm172_vm2, %v265_v4, 0.0 }
 0x2e1   :  { %v272_v8 = vadd.f32 %v271_v7, %v270_v5 }
 0x2e3   :  { %v273_v9 = vrot.slane %v272_v8, 4 }
 0x2e5   :  { %v274_v11 = vadd.f32 %v273_v9, %v272_v8 }
 0x2e7   :  { %v275_v12 = vrot.slane %v274_v11, 2 }
 0x2e9   :  { %v276_v14 = vadd.f32 %v275_v12, %v274_v11 }
 0x2eb   :  { %v277_v15 = vrot.slane %v276_v14, 1 }
 0x2ed   :  { %v278_v19 = vadd.f32 %v277_v15, %v276_v14 }
 0x2ef   :  { %v286_v23 = vmul.f32 %v938_v16, %v278_v19 }
 0x2f1   :  { %v287_v27 = vsub.f32 %v262_v56, %v286_v23  ;;  %v288_v28 = vsub.f32 %v263_v55, %v286_v23  ;;  %v289_v31 = vsub.f32 %v264_v57, %v286_v23  ;;  %v290_v32 = vsub.f32 %v265_v4, %v286_v23 }
 0x2f3   :  { %v291_v35 = vmul.f32 %v287_v27, %v287_v27  ;;  %v292_v36 = vmul.f32 %v288_v28, %v288_v28  ;;  %v293_v38 = vmul.f32 %v289_v31, %v289_v31  ;;  %v294_v39 = vmul.f32 %v290_v32, %v290_v32 }
 0x2f4   :  { %v313_v62 = vmul.f32 %v698_v59, %v287_v27  ;;  %v314_v0 = vmul.f32 %v698_v59, %v288_v28  ;;  %v315_v6 = vmul.f32 %v698_v59, %v289_v31  ;;  %v316_v9 = vmul.f32 %v698_v59, %v290_v32 }
 0x2f5   :  { %v295_v40 = vsel %vm172_vm2, %v291_v35, 0.0  ;;  %v296_v41 = vsel %vm172_vm2, %v292_v36, 0.0  ;;  %v298_v43 = vsel %vm172_vm2, %v293_v38, 0.0  ;;  %v300_v45 = vsel %vm172_vm2, %v294_v39, 0.0 }
 0x2f6   :  { %v297_v42 = vadd.f32 %v296_v41, %v295_v40 }
 0x2f8   :  { %v299_v44 = vadd.f32 %v298_v43, %v297_v42 }
 0x2fa   :  { %v301_v46 = vadd.f32 %v300_v45, %v299_v44 }
 0x2fc   :  { %v302_v47 = vrot.slane %v301_v46, 4 }
 0x2fe   :  { %v303_v48 = vadd.f32 %v302_v47, %v301_v46 }
 0x300   :  { %v304_v49 = vrot.slane %v303_v48, 2 }
 0x302   :  { %v305_v50 = vadd.f32 %v304_v49, %v303_v48 }
 0x304   :  { %v306_v51 = vrot.slane %v305_v50, 1 }
 0x306   :  { %v307_v52 = vadd.f32 %v306_v51, %v305_v50 }
 0x308   :  { %v308_v53 = vmul.f32 %v307_v52, %v938_v16 }
 0x30a   :  { %v317_v54 = vadd.f32 1e-05, %v308_v53 }
 0x30c   :  { %704 = vrsqrt.f32 %v317_v54  ;;  %vm324_vm8 = vweird.f32 %v317_v54 }
 0x312   :  { %v705_v55 = vpop.eup %704 }
 0x313   :  { %v319_v56 = vmul.f32 %v705_v55, %v317_v54  ;;  %vm325_vm7 = vweird.f32 %v705_v55 }
 0x314   :  { %vm326_vm9 = vmor %vm324_vm8, %vm325_vm7 }
 0x315   :  { %v320_v57 = vmul.f32 %v705_v55, %v319_v56 }
 0x317   :  { %v321_v58 = vmul.f32 0.5, %v320_v57 }
 0x319   :  { %v322_v60 = vsub.f32 1.5, %v321_v58 }
 0x31b   :  { %v323_v61 = vmul.f32 %v705_v55, %v322_v60 }
 0x31d   :  { %v327_v1 = vsel %vm326_vm9, %v705_v55, %v323_v61 }
 0x31e   :  { %v328_v2 = vmul.f32 %v327_v1, %v313_v62  ;;  %v329_v3 = vmul.f32 %v327_v1, %v314_v0  ;;  %v330_v7 = vmul.f32 %v327_v1, %v315_v6  ;;  %v331_v10 = vmul.f32 %v327_v1, %v316_v9  ;;  %v487_v1 = vld [vmem:[%s1052_s8 + $0x10] sm:$0xff] }
 0x320   :  { %v336_v4 = vadd.f32 %v699_v63, %v328_v2  ;;  %v337_v5 = vadd.f32 %v699_v63, %v329_v3  ;;  %v338_v8 = vadd.f32 %v699_v63, %v330_v7  ;;  %v339_v11 = vadd.f32 %v699_v63, %v331_v10  ;;  %v488_v63 = vld [vmem:[%s1052_s8 + $0x18] sm:$0xff]  ;;  %v486_v3 = vld [vmem:[%s1052_s8 + $0x8] sm:$0xff] }
 0x321   :  { %513 = vmatpush.msra.mxu0 %v488_v63 }
 0x322   :  { %669 = vmatmul.msk.f32.vlgmr.msrb.gmra.mxu0 %vm172_vm2, %v336_v4  ;;  %670 = vmatmul.msk.f32.vlgmr.msra.gmra.mxu3 %vm172_vm2, %v337_v5  ;;  %v485_v4 = vld [vmem:[%s1052_s8] sm:$0xff] }
 0x323   :  { %514 = vmatpush.msra.mxu0 %v487_v1 }
 0x325   :  { %515 = vmatpush.msra.mxu0 %v486_v3 }
 0x327   :  { %516 = vmatpush.msra.mxu0 %v485_v4 }
 0x32a   :  { %671 = vmatmul.msk.f32.gmra.mxu3 %vm172_vm2, %v338_v8 }
 0x332   :  { %672 = vmatmul.msk.f32.gmra.mxu3 %vm172_vm2, %v339_v11 }
 0x39f   :  { %v373_v15 = vpop.f32.mrf.mxu0 }
 0x3a5   :  { %v376_v12 = vpop.f32.mrf.mxu3 }
 0x3ad   :  { %v379_v13 = vpop.f32.mrf.mxu3 }
 0x3b5   :  { %v382_v14 = vpop.f32.mrf.mxu3 }
 0x3b6   :  { %397 = vmatpush.msrb.mxu1 %v382_v14 }
 0x3b8   :  { %398 = vmatpush.msrb.mxu1 %v379_v13 }
 0x3ba   :  { %399 = vmatpush.msrb.mxu1 %v376_v12 }
 0x3bc   :  { %400 = vmatpush.msrb.mxu1 %v373_v15  ;;  %v700_v15 = vld [vmem:[%s1050_s6] ss:$0 sm:$0xff]  ;;  %s762_s6 = smov [#allocation2]  }
 0x3bd   :  { %673 = vmatmul.msk.f32.vlgmr.msrb.gmra.mxu1 %vm172_vm2, %v866_v25 }
 0x3c5   :  { %674 = vmatmul.msk.f32.gmra.mxu1 %vm172_vm2, %v878_v29 }
 0x3cd   :  { %675 = vmatmul.msk.f32.gmra.mxu1 %vm172_vm2, %v890_v33 }
 0x3d5   :  { %676 = vmatmul.msk.f32.gmra.mxu1 %vm172_vm2, %v902_v37 }
 0x43a   :  { %v402_v17 = vpop.f32.mrf.mxu1 }
 0x43b   :  { %v414_v23 = vmax.f32 %v402_v17, 0.0 }
 0x43d   :  { %v418_v28 = vsel %vm172_vm2, %v414_v23, 0.0 }
 0x442   :  { %v405_v18 = vpop.f32.mrf.mxu1 }
 0x443   :  { %v415_v20 = vmax.f32 %v405_v18, 0.0 }
 0x445   :  { %v419_v27 = vsel %vm172_vm2, %v415_v20, 0.0 }
 0x446   :  { %v420_v32 = vadd.f32 %v419_v27, %v418_v28 }
 0x44a   :  { %v408_v19 = vpop.f32.mrf.mxu1 }
 0x44b   :  { %v416_v24 = vmax.f32 %v408_v19, 0.0 }
 0x44d   :  { %v421_v31 = vsel %vm172_vm2, %v416_v24, 0.0 }
 0x44e   :  { %v422_v38 = vadd.f32 %v421_v31, %v420_v32 }
 0x452   :  { %v411_v35 = vpop.f32.mrf.mxu1 }
 0x453   :  { %v417_v36 = vmax.f32 %v411_v35, 0.0 }
 0x455   :  { %v423_v39 = vsel %vm172_vm2, %v417_v36, 0.0 }
 0x456   :  { %v424_v40 = vadd.f32 %v423_v39, %v422_v38 }
 0x458   :  { %v425_v41 = vrot.slane %v424_v40, 4 }
 0x45a   :  { %v426_v42 = vadd.f32 %v425_v41, %v424_v40 }
 0x45c   :  { %v427_v43 = vrot.slane %v426_v42, 2 }
 0x45e   :  { %v428_v44 = vadd.f32 %v427_v43, %v426_v42 }
 0x460   :  { %v429_v45 = vrot.slane %v428_v44, 1 }
 0x462   :  { %v430_v46 = vadd.f32 %v429_v45, %v428_v44 }
 0x464   :  { %v431_v47 = vmul.f32 %v430_v46, %v938_v16 }
 0x466   :  { %v432_v48 = vsub.f32 %v414_v23, %v431_v47  ;;  %v433_v49 = vsub.f32 %v415_v20, %v431_v47  ;;  %v434_v50 = vsub.f32 %v416_v24, %v431_v47  ;;  %v435_v51 = vsub.f32 %v417_v36, %v431_v47 }
 0x468   :  { %v436_v52 = vmul.f32 %v432_v48, %v432_v48  ;;  %v437_v53 = vmul.f32 %v433_v49, %v433_v49  ;;  %v438_v54 = vmul.f32 %v434_v50, %v434_v50  ;;  %v439_v55 = vmul.f32 %v435_v51, %v435_v51 }
 0x469   :  { %v458_v19 = vmul.f32 %v700_v15, %v432_v48  ;;  %v459_v27 = vmul.f32 %v700_v15, %v433_v49  ;;  %v460_v32 = vmul.f32 %v700_v15, %v434_v50  ;;  %v461_v38 = vmul.f32 %v700_v15, %v435_v51 }
 0x46a   :  { %v440_v56 = vsel %vm172_vm2, %v436_v52, 0.0  ;;  %v441_v57 = vsel %vm172_vm2, %v437_v53, 0.0  ;;  %v443_v59 = vsel %vm172_vm2, %v438_v54, 0.0  ;;  %v445_v61 = vsel %vm172_vm2, %v439_v55, 0.0 }
 0x46b   :  { %v442_v58 = vadd.f32 %v441_v57, %v440_v56 }
 0x46d   :  { %v444_v60 = vadd.f32 %v443_v59, %v442_v58 }
 0x46f   :  { %v446_v62 = vadd.f32 %v445_v61, %v444_v60 }
 0x471   :  { %v447_v0 = vrot.slane %v446_v62, 4 }
 0x473   :  { %v448_v2 = vadd.f32 %v447_v0, %v446_v62 }
 0x475   :  { %v449_v5 = vrot.slane %v448_v2, 2 }
 0x477   :  { %v450_v6 = vadd.f32 %v449_v5, %v448_v2 }
 0x479   :  { %v451_v7 = vrot.slane %v450_v6, 1 }
 0x47b   :  { %v452_v8 = vadd.f32 %v451_v7, %v450_v6 }
 0x47d   :  { %v453_v9 = vmul.f32 %v452_v8, %v938_v16  ;;  %v701_v16 = vld [vmem:[%s1051_s7] ss:$0 sm:$0xff]  ;;  %s619_s7 = sshll.u32 %s762_s6, 4  ;;  %s620_s7 = int_to_ptr.vmem [resolvable:$true] %s619_s7 }
 0x47e   :  { %627 = dma.vmem_to_hbm [thread:$0]  %s620_s7, 512, %s622_s1, [#allocation3], %s763_s2, %s763_s2, %s764_s28  }
 0x47f   :  { %v462_v10 = vadd.f32 1e-05, %v453_v9 }
 0x481   :  { %706 = vrsqrt.f32 %v462_v10  ;;  %vm469_vm11 = vweird.f32 %v462_v10 }
 0x487   :  { %v707_v11 = vpop.eup %706 }
 0x488   :  { %v464_v12 = vmul.f32 %v707_v11, %v462_v10  ;;  %vm470_vm10 = vweird.f32 %v707_v11 }
 0x489   :  { %vm471_vm12 = vmor %vm469_vm11, %vm470_vm10 }
 0x48a   :  { %v465_v13 = vmul.f32 %v707_v11, %v464_v12 }
 0x48c   :  { %v466_v14 = vmul.f32 0.5, %v465_v13 }
 0x48e   :  { %v467_v17 = vsub.f32 1.5, %v466_v14 }
 0x490   :  { %v468_v18 = vmul.f32 %v707_v11, %v467_v17 }
 0x492   :  { %v472_v20 = vsel %vm471_vm12, %v707_v11, %v468_v18 }
 0x493   :  { %v473_v23 = vmul.f32 %v472_v20, %v458_v19  ;;  %v474_v28 = vmul.f32 %v472_v20, %v459_v27  ;;  %v475_v35 = vmul.f32 %v472_v20, %v460_v32  ;;  %v476_v39 = vmul.f32 %v472_v20, %v461_v38 }
 0x495   :  { %v481_v24 = vadd.f32 %v701_v16, %v473_v23  ;;  %v482_v31 = vadd.f32 %v701_v16, %v474_v28  ;;  %v483_v36 = vadd.f32 %v701_v16, %v475_v35  ;;  %v484_v40 = vadd.f32 %v701_v16, %v476_v39 }
 0x497   :  { %677 = vmatmul.msk.f32.vlgmr.msra.gmra.mxu0 %vm172_vm2, %v481_v24 }
 0x49f   :  { %678 = vmatmul.msk.f32.gmra.mxu0 %vm172_vm2, %v482_v31 }
 0x4a7   :  { %679 = vmatmul.msk.f32.gmra.mxu0 %vm172_vm2, %v483_v36 }
 0x4af   :  { %680 = vmatmul.msk.f32.gmra.mxu0 %vm172_vm2, %v484_v40 }
 0x514   :  { %v518_v41 = vpop.f32.mrf.mxu0 }
 0x51c   :  { %v521_v42 = vpop.f32.mrf.mxu0 }
 0x524   :  { %v524_v43 = vpop.f32.mrf.mxu0 }
 0x52c   :  { %v527_v44 = vpop.f32.mrf.mxu0 }
 0x52d   :  { %542 = vmatpush.msrb.mxu3 %v527_v44 }
 0x52f   :  { %543 = vmatpush.msrb.mxu3 %v524_v43 }
 0x531   :  { %544 = vmatpush.msrb.mxu3 %v521_v42 }
 0x533   :  { %545 = vmatpush.msrb.mxu3 %v518_v41 }
 0x534   :  { %681 = vmatmul.msk.f32.vlgmr.msrb.gmra.mxu3 %vm172_vm2, %v866_v25 }
 0x53c   :  { %682 = vmatmul.msk.f32.gmra.mxu3 %vm172_vm2, %v878_v29 }
 0x544   :  { %683 = vmatmul.msk.f32.gmra.mxu3 %vm172_vm2, %v890_v33 }
 0x54c   :  { %684 = vmatmul.msk.f32.gmra.mxu3 %vm172_vm2, %v902_v37 }
 0x5b7   :  { %v547_v45 = vpop.f32.mrf.mxu3 }
 0x5b8   :  { %v559_v46 = vmax.f32 %v547_v45, 0.0 }
 0x5ba   :  { %563 = vxpose.xlu0.b32.start [1/4] (short) (narrow) %v559_v46, 32 }
 0x5bf   :  { %v550_v47 = vpop.f32.mrf.mxu3 }
 0x5c0   :  { %v560_v48 = vmax.f32 %v550_v47, 0.0 }
 0x5c2   :  { %564 = vxpose.xlu0.b32.cont [2/4] (short) (narrow) %v560_v48, 32 }
 0x5c7   :  { %v553_v49 = vpop.f32.mrf.mxu3 }
 0x5c8   :  { %v561_v50 = vmax.f32 %v553_v49, 0.0 }
 0x5ca   :  { %565 = vxpose.xlu0.b32.cont [3/4] (short) (narrow) %v561_v50, 32 }
 0x5cf   :  { %v556_v51 = vpop.f32.mrf.mxu3 }
 0x5d0   :  { %v562_v25 = vmax.f32 %v556_v51, 0.0 }
 0x5d2   :  { %566 = vxpose.xlu0.b32.end [4/4] (short) (narrow) %v562_v25, 32 }
 0x65e   :  { %v579_v29 = vpop.trf.xlu0 }
 0x65f   :  { %v595_v33 = vadd.f32 %v579_v29, %v559_v46 }
 0x661   :  { %v599_v37 = vmul.f32 0.5, %v595_v33 }
 0x663   :  { %v603_v52 = vsel %vm43_vm1, 1.0, %v599_v37 }
 0x664   :  { %v607_v53 = vand.u32 2147483647, %v603_v52 }
 0x666   :  { %611 = vst.msk [vmem:[#allocation4] sm:$0xff] %vm172_vm2, %v607_v53  ;;  %v580_v54 = vpop.trf.xlu0 }
 0x667   :  { %v596_v55 = vadd.f32 %v580_v54, %v560_v48 }
 0x669   :  { %v600_v56 = vmul.f32 0.5, %v596_v55 }
 0x66b   :  { %v604_v57 = vsel %vm44_vm3, 1.0, %v600_v56 }
 0x66c   :  { %v608_v58 = vand.u32 2147483647, %v604_v57 }
 0x66e   :  { %612 = vst.msk [vmem:[#allocation4 + $0x8] sm:$0xff] %vm172_vm2, %v608_v58  ;;  %v581_v59 = vpop.trf.xlu0 }
 0x66f   :  { %v597_v60 = vadd.f32 %v581_v59, %v561_v50 }
 0x671   :  { %v601_v61 = vmul.f32 0.5, %v597_v60 }
 0x673   :  { %v605_v21 = vsel %vm45_vm4, 1.0, %v601_v61 }
 0x674   :  { %v609_v62 = vand.u32 2147483647, %v605_v21 }
 0x676   :  { %613 = vst.msk [vmem:[#allocation4 + $0x10] sm:$0xff] %vm172_vm2, %v609_v62  ;;  %v582_v63 = vpop.trf.xlu0 }
 0x677   :  { %v598_v0 = vadd.f32 %v582_v63, %v562_v25 }
 0x679   :  { %v602_v1 = vmul.f32 0.5, %v598_v0 }
 0x67b   :  { %v606_v26 = vsel %vm46_vm5, 1.0, %v602_v1 }
 0x67c   :  { %v610_v2 = vand.u32 2147483647, %v606_v26 }
 0x67e   :  { %614 = vst.msk [vmem:[#allocation4 + $0x18] sm:$0xff] %vm172_vm2, %v610_v2 }
 0x67f   :  { %640 = dma.vmem_to_hbm [thread:$0]  %s633_s29, 512, %s635_s12, [#allocation5], %s763_s2, %s763_s2, %s764_s28  }
 0x680   :  { %756 = dma.done.wait [#allocation3], 512  }
 0x681   :  { %757 = vsyncadd [#allocation3], 4294966784 }
 0x682   :  { %758 = dma.done.wait [#allocation5], 512  }
 0x683   :  { %759 = vsyncadd [#allocation5], 4294966784 }
 0x684   :  { %649 = vsyncpa [#allocation3], 1 }
 0x685   :  { %650 = vsyncpa [#allocation5], 1 }

</bundles_post_ra>
